<compile_context>
chip_gen: v7x
topology: tpu7x:2x2x1
jax: 0.10.0
libtpu: 0.0.40
codegen_flags: <defaults>
</compile_context>

<pallas_src>
import numpy as np
import jax
import jax.numpy as jnp
from jax.experimental import pallas as pl
from jax.experimental.pallas import tpu as pltpu


# ----------------------------------------------------------------------------
# Fused Pallas kernel: conv1 + BN1 + LReLU + conv2 + BN2 + LReLU + fc
# ----------------------------------------------------------------------------
def _disc_fused_kernel(p1_ref, w1_ref, g1_ref, b1_ref, sel_ref, w2_ref,
                       g2_ref, b2_ref, fcw_ref, gsel_ref, fcb_ref, o_ref):
    """All-resident fused Discriminator forward.

    p1_ref  : [M1, K1]         bf16  im2col patches of the input (rows = (n,h,w))
    w1_ref  : [K1, 64]         bf16  conv1 weight, K ordered (C,kh,kw)
    g1/b1   : [1, 64]          f32   BN1 gamma / beta
    sel_ref : [16*M2, M1]      bf16  stacked 0/1 tap-selection matrix (rows = (tap, m2))
    w2_ref  : [16, 64, 128]    bf16  conv2 weight per tap (kh,kw)
    g2/b2   : [1, 128]         f32   BN2 gamma / beta
    fcw_ref : [M2, 128]        f32   fc weight rearranged to (row=n*P+p, channel)
    gsel_ref: [N, M2]          f32   per-sample row-group selector
    fcb_ref : [1, 1]           f32   fc bias
    o_ref   : [N, 1]           f32   output logits
    """
    n_taps = w2_ref.shape[0]           # k*k = 16
    m1 = p1_ref.shape[0]               # N*H1*W1
    m2 = gsel_ref.shape[1]             # N*H2*W2
    cout2 = w2_ref.shape[2]            # 128

    # ---- conv1: im2col matmul (bf16 inputs, f32 accumulation) ---------------
    y1 = jnp.dot(p1_ref[...], w1_ref[...],
                 preferred_element_type=jnp.float32)            # [M1, 64] f32

    # ---- BN1: one-pass batch stats, folded to scale/shift -------------------
    inv_m1 = 1.0 / m1
    mean1 = jnp.sum(y1, axis=0, keepdims=True) * inv_m1
    ex2_1 = jnp.sum(y1 * y1, axis=0, keepdims=True) * inv_m1
    var1 = ex2_1 - mean1 * mean1
    scale1 = g1_ref[...] * jax.lax.rsqrt(var1 + 1e-5)
    shift1 = b1_ref[...] - mean1 * scale1
    z1 = y1 * scale1 + shift1
    a1 = jnp.where(z1 > 0, z1, 0.2 * z1).astype(jnp.bfloat16)   # [M1, 64] bf16

    # ---- conv2: single gather matmul for all 16 taps (spatial gather + zero
    # padding done on the MXU), then 16 accumulating weight matmuls. ----------
    gathered = jnp.dot(sel_ref[...], a1,
                       preferred_element_type=jnp.float32)      # [16*M2, 64]
    gathered = gathered.astype(jnp.bfloat16)   # exact: 0/1 selection of bf16 vals

    acc2 = jnp.zeros((m2, cout2), jnp.float32)
    for t in range(n_taps):            # static, unrolled
        acc2 = acc2 + jnp.dot(gathered[t * m2:(t + 1) * m2, :], w2_ref[t],
                              preferred_element_type=jnp.float32)

    # ---- BN2 + LeakyReLU -----------------------------------------------------
    inv_m2 = 1.0 / m2
    mean2 = jnp.sum(acc2, axis=0, keepdims=True) * inv_m2
    ex2_2 = jnp.sum(acc2 * acc2, axis=0, keepdims=True) * inv_m2
    var2 = ex2_2 - mean2 * mean2
    scale2 = g2_ref[...] * jax.lax.rsqrt(var2 + 1e-5)
    shift2 = b2_ref[...] - mean2 * scale2
    z2 = acc2 * scale2 + shift2
    a2 = jnp.where(z2 > 0, z2, 0.2 * z2)                        # [M2, 128] f32

    # ---- fc epilogue: elementwise weight multiply + per-sample reduction ----
    rowsum = jnp.sum(a2 * fcw_ref[...], axis=1, keepdims=True)  # [M2, 1]
    o_ref[...] = (jnp.dot(gsel_ref[...], rowsum,
                          preferred_element_type=jnp.float32)
                  + fcb_ref[...])


def _discriminator_pallas(p1, w1, g1, b1, sel, w2, g2, b2, fcw, gsel, fcb):
    n = gsel.shape[0]
    return pl.pallas_call(
        _disc_fused_kernel,
        out_shape=jax.ShapeDtypeStruct((n, 1), jnp.float32),
        grid=(1,),
        in_specs=[
            pl.BlockSpec(p1.shape, lambda i: (0, 0)),
            pl.BlockSpec(w1.shape, lambda i: (0, 0)),
            pl.BlockSpec(g1.shape, lambda i: (0, 0)),
            pl.BlockSpec(b1.shape, lambda i: (0, 0)),
            pl.BlockSpec(sel.shape, lambda i: (0, 0)),
            pl.BlockSpec(w2.shape, lambda i: (0, 0, 0)),
            pl.BlockSpec(g2.shape, lambda i: (0, 0)),
            pl.BlockSpec(b2.shape, lambda i: (0, 0)),
            pl.BlockSpec(fcw.shape, lambda i: (0, 0)),
            pl.BlockSpec(gsel.shape, lambda i: (0, 0)),
            pl.BlockSpec(fcb.shape, lambda i: (0, 0)),
        ],
        out_specs=pl.BlockSpec((n, 1), lambda i: (0, 0)),
        compiler_params=pltpu.CompilerParams(
            dimension_semantics=("arbitrary",)),
    )(p1, w1, g1, b1, sel, w2, g2, b2, fcw, gsel, fcb)


# ----------------------------------------------------------------------------
# Trace-time glue (layout only, no hot-path compute)
# ----------------------------------------------------------------------------
def im2col(x_nchw, k=4, s=2, p=1):
    """im2col of the raw input. Rows ordered (n,h,w); K ordered (C,kh,kw)."""
    N, C, H, W = x_nchw.shape
    xp = jnp.pad(x_nchw, ((0, 0), (0, 0), (p, p), (p, p)))
    Ho = (H + 2 * p - k) // s + 1
    Wo = (W + 2 * p - k) // s + 1
    cols = []
    for kh in range(k):
        for kw in range(k):
            cols.append(xp[:, :, kh: kh + s * Ho: s, kw: kw + s * Wo: s])
    pat = jnp.stack(cols, axis=0).reshape(k, k, N, C, Ho, Wo)
    pat = pat.transpose(2, 4, 5, 3, 0, 1)          # [N, Ho, Wo, C, k, k]
    return pat.reshape(N * Ho * Wo, C * k * k), Ho, Wo


def _conv2_tap_selectors(N, H1, W1, H2, W2, k=4, s=2, p=1):
    """Stacked 0/1 selection matrix [k*k*M2, M1]: row (t, m2) picks the tap-t
    input row for output position m2 (zero row where the tap hits padding)."""
    M1, M2 = N * H1 * W1, N * H2 * W2
    sel = np.zeros((k * k, M2, M1), np.float32)
    for kh in range(k):
        for kw in range(k):
            t = kh * k + kw
            for n in range(N):
                for oh in range(H2):
                    for ow in range(W2):
                        h = s * oh - p + kh
                        w = s * ow - p + kw
                        if 0 <= h < H1 and 0 <= w < W1:
                            sel[t, (n * H2 + oh) * W2 + ow,
                                   (n * H1 + h) * W1 + w] = 1.0
    return sel.reshape(k * k * M2, M1)


# ----------------------------------------------------------------------------
# Discriminator forward
# ----------------------------------------------------------------------------
def discriminator_forward(x, params):
    N = x.shape[0]
    k = 4

    p1, H1, W1 = im2col(x, k=k, s=2, p=1)                       # [N*H1*W1, C*16]
    H2 = (H1 + 2 - k) // 2 + 1
    W2 = (W1 + 2 - k) // 2 + 1

    # Weight re-layouts (done once at trace time -> free).
    w1 = params["conv1_w"].reshape(64, -1).T                    # [C*16, 64]
    w2 = params["conv2_w"].transpose(2, 3, 1, 0).reshape(k * k, 64, 128)
    # fc weight: PyTorch flatten order is (c, h, w); rearrange to rows indexed
    # by (h*W2+w, c) and tile over the batch so the kernel applies it
    # elementwise against the resident [M2, 128] activation tile.
    fcw = jnp.tile(params["fc_w"][:, 0].reshape(128, H2 * W2).T, (N, 1))

    # Constant gather / grouping matrices (built with numpy at trace time).
    sel = jnp.asarray(_conv2_tap_selectors(N, H1, W1, H2, W2, k), jnp.bfloat16)
    gsel = jnp.asarray(np.kron(np.eye(N, dtype=np.float32),
                               np.ones((1, H2 * W2), np.float32)))

    return _discriminator_pallas(
        p1.astype(jnp.bfloat16), w1.astype(jnp.bfloat16),
        params["bn1_g"][None, :], params["bn1_b"][None, :],
        sel, w2.astype(jnp.bfloat16),
        params["bn2_g"][None, :], params["bn2_b"][None, :],
        fcw, gsel, params["fc_b"])


def init_params(key, image_size=16, num_channels=1):
    ks = jax.random.split(key, 6)
    fc_in = 128 * (image_size // 4) * (image_size // 4)
    return {
        # Conv2d weights: normal(0, 0.02), bias=False
        "conv1_w": 0.02 * jax.random.normal(ks[0], (64, num_channels, 4, 4), jnp.float32),
        "conv2_w": 0.02 * jax.random.normal(ks[1], (128, 64, 4, 4), jnp.float32),
        # BatchNorm2d: weight ~ normal(1, 0.02), bias = 0
        "bn1_g": 1.0 + 0.02 * jax.random.normal(ks[2], (64,), jnp.float32),
        "bn1_b": jnp.zeros((64,), jnp.float32),
        "bn2_g": 1.0 + 0.02 * jax.random.normal(ks[3], (128,), jnp.float32),
        "bn2_b": jnp.zeros((128,), jnp.float32),
        # Linear (deterministic synthetic init, scaled ~ 1/sqrt(fan_in))
        "fc_w": jax.random.normal(ks[4], (fc_in, 1), jnp.float32) / jnp.sqrt(float(fc_in)),
        "fc_b": jnp.zeros((1, 1), jnp.float32),
    }


if __name__ == "__main__":
    key = jax.random.PRNGKey(0)
    k_param, k_x = jax.random.split(key)

    image_size, num_channels, batch = 16, 1, 2
    params = init_params(k_param, image_size=image_size, num_channels=num_channels)
    x = jax.random.normal(k_x, (batch, num_channels, image_size, image_size), jnp.float32)

    out = jax.jit(discriminator_forward)(x, params)
    out = jax.block_until_ready(out)
    assert out.shape == (batch, 1) and out.dtype == jnp.float32
    print("KERNEL_OK")
</pallas_src>

<mosaic_0001>
module attributes {stable_mosaic.version = 11 : i64} {
  func.func @_disc_fused_kernel(%arg0: i32, %arg1: memref<128x16xbf16, #tpu.memory_space<vmem>>, %arg2: memref<16x64xbf16, #tpu.memory_space<vmem>>, %arg3: memref<1x64xf32, #tpu.memory_space<vmem>>, %arg4: memref<1x64xf32, #tpu.memory_space<vmem>>, %arg5: memref<512x128xbf16, #tpu.memory_space<vmem>>, %arg6: memref<16x64x128xbf16, #tpu.memory_space<vmem>>, %arg7: memref<1x128xf32, #tpu.memory_space<vmem>>, %arg8: memref<1x128xf32, #tpu.memory_space<vmem>>, %arg9: memref<32x128xf32, #tpu.memory_space<vmem>>, %arg10: memref<2x32xf32, #tpu.memory_space<vmem>>, %arg11: memref<1x1xf32, #tpu.memory_space<vmem>>, %arg12: memref<2x1xf32, #tpu.memory_space<vmem>>) attributes {dimension_semantics = [#tpu.dimension_semantics<arbitrary>], iteration_bounds = array<i64: 1>, scalar_prefetch = 0 : i64, scratch_operands = 0 : i64, tpu.core_type = #tpu.core_type<tc>, window_params = [{pipeline_mode = #tpu.pipeline_mode<synchronous>, transform_indices = @transform_0, window_bounds = array<i64: 128, 16>}, {pipeline_mode = #tpu.pipeline_mode<synchronous>, transform_indices = @transform_1, window_bounds = array<i64: 16, 64>}, {pipeline_mode = #tpu.pipeline_mode<synchronous>, transform_indices = @transform_2, window_bounds = array<i64: 1, 64>}, {pipeline_mode = #tpu.pipeline_mode<synchronous>, transform_indices = @transform_3, window_bounds = array<i64: 1, 64>}, {pipeline_mode = #tpu.pipeline_mode<synchronous>, transform_indices = @transform_4, window_bounds = array<i64: 512, 128>}, {pipeline_mode = #tpu.pipeline_mode<synchronous>, transform_indices = @transform_5, window_bounds = array<i64: 16, 64, 128>}, {pipeline_mode = #tpu.pipeline_mode<synchronous>, transform_indices = @transform_6, window_bounds = array<i64: 1, 128>}, {pipeline_mode = #tpu.pipeline_mode<synchronous>, transform_indices = @transform_7, window_bounds = array<i64: 1, 128>}, {pipeline_mode = #tpu.pipeline_mode<synchronous>, transform_indices = @transform_8, window_bounds = array<i64: 32, 128>}, {pipeline_mode = #tpu.pipeline_mode<synchronous>, transform_indices = @transform_9, window_bounds = array<i64: 2, 32>}, {pipeline_mode = #tpu.pipeline_mode<synchronous>, transform_indices = @transform_10, window_bounds = array<i64: 1, 1>}, {pipeline_mode = #tpu.pipeline_mode<synchronous>, transform_indices = @transform_11, window_bounds = array<i64: 2, 1>}]} {
    %c0 = arith.constant 0 : index
    %c0_0 = arith.constant 0 : index
    %0 = vector.load %arg1[%c0, %c0_0] : memref<128x16xbf16, #tpu.memory_space<vmem>>, vector<128x16xbf16>
    %c0_1 = arith.constant 0 : index
    %c0_2 = arith.constant 0 : index
    %1 = vector.load %arg2[%c0_1, %c0_2] : memref<16x64xbf16, #tpu.memory_space<vmem>>, vector<16x64xbf16>
    %cst = arith.constant dense<0.000000e+00> : vector<128x64xf32>
    %2 = tpu.matmul %0, %1, %cst {dimension_numbers = #tpu.dot_dimension_numbers<[1], [0], [0], [1], [0, 0, 1, 1], [], []>} : vector<128x16xbf16>, vector<16x64xbf16>, vector<128x64xf32> -> vector<128x64xf32>
    %cst_3 = arith.constant dense<0.000000e+00> : vector<64xf32>
    %3 = vector.multi_reduction <add>, %2, %cst_3 [0] : vector<128x64xf32> to vector<64xf32>
    %4 = vector.shape_cast %3 : vector<64xf32> to vector<1x64xf32>
    %cst_4 = arith.constant 7.812500e-03 : f32
    %5 = vector.broadcast %cst_4 : f32 to vector<1x64xf32>
    %6 = arith.mulf %4, %5 : vector<1x64xf32>
    %7 = arith.mulf %2, %2 : vector<128x64xf32>
    %cst_5 = arith.constant dense<0.000000e+00> : vector<64xf32>
    %8 = vector.multi_reduction <add>, %7, %cst_5 [0] : vector<128x64xf32> to vector<64xf32>
    %9 = vector.shape_cast %8 : vector<64xf32> to vector<1x64xf32>
    %cst_6 = arith.constant 7.812500e-03 : f32
    %10 = vector.broadcast %cst_6 : f32 to vector<1x64xf32>
    %11 = arith.mulf %9, %10 : vector<1x64xf32>
    %12 = arith.mulf %6, %6 : vector<1x64xf32>
    %13 = arith.subf %11, %12 : vector<1x64xf32>
    %c0_7 = arith.constant 0 : index
    %c0_8 = arith.constant 0 : index
    %14 = vector.load %arg3[%c0_7, %c0_8] : memref<1x64xf32, #tpu.memory_space<vmem>>, vector<1x64xf32>
    %cst_9 = arith.constant 9.99999974E-6 : f32
    %15 = vector.broadcast %cst_9 : f32 to vector<1x64xf32>
    %16 = arith.addf %13, %15 : vector<1x64xf32>
    %17 = math.rsqrt %16 : vector<1x64xf32>
    %18 = arith.mulf %14, %17 : vector<1x64xf32>
    %c0_10 = arith.constant 0 : index
    %c0_11 = arith.constant 0 : index
    %19 = vector.load %arg4[%c0_10, %c0_11] : memref<1x64xf32, #tpu.memory_space<vmem>>, vector<1x64xf32>
    %20 = arith.mulf %6, %18 : vector<1x64xf32>
    %21 = arith.subf %19, %20 : vector<1x64xf32>
    %22 = vector.broadcast %18 : vector<1x64xf32> to vector<128x64xf32>
    %23 = arith.mulf %2, %22 : vector<128x64xf32>
    %24 = vector.broadcast %21 : vector<1x64xf32> to vector<128x64xf32>
    %25 = arith.addf %23, %24 : vector<128x64xf32>
    %cst_12 = arith.constant 0.000000e+00 : f32
    %26 = vector.broadcast %cst_12 : f32 to vector<128x64xf32>
    %27 = arith.cmpf ogt, %25, %26 : vector<128x64xf32>
    %cst_13 = arith.constant 2.000000e-01 : f32
    %28 = vector.broadcast %cst_13 : f32 to vector<128x64xf32>
    %29 = arith.mulf %28, %25 : vector<128x64xf32>
    %30 = arith.select %27, %25, %29 : vector<128x64xi1>, vector<128x64xf32>
    %31 = arith.truncf %30 : vector<128x64xf32> to vector<128x64xbf16>
    %c0_14 = arith.constant 0 : index
    %c0_15 = arith.constant 0 : index
    %32 = vector.load %arg5[%c0_14, %c0_15] : memref<512x128xbf16, #tpu.memory_space<vmem>>, vector<512x128xbf16>
    %cst_16 = arith.constant dense<0.000000e+00> : vector<512x64xf32>
    %33 = tpu.matmul %32, %31, %cst_16 {dimension_numbers = #tpu.dot_dimension_numbers<[1], [0], [0], [1], [0, 0, 1, 1], [], []>} : vector<512x128xbf16>, vector<128x64xbf16>, vector<512x64xf32> -> vector<512x64xf32>
    %34 = arith.truncf %33 : vector<512x64xf32> to vector<512x64xbf16>
    %cst_17 = arith.constant 0.000000e+00 : f32
    %35 = vector.broadcast %cst_17 : f32 to vector<32x128xf32>
    %36 = vector.extract_strided_slice %34 {offsets = [0, 0], sizes = [32, 64], strides = [1, 1]} : vector<512x64xbf16> to vector<32x64xbf16>
    %c0_18 = arith.constant 0 : index
    %c0_19 = arith.constant 0 : index
    %c0_20 = arith.constant 0 : index
    %37 = vector.load %arg6[%c0_18, %c0_19, %c0_20] : memref<16x64x128xbf16, #tpu.memory_space<vmem>>, vector<1x64x128xbf16>
    %38 = vector.shape_cast %37 : vector<1x64x128xbf16> to vector<64x128xbf16>
    %cst_21 = arith.constant dense<0.000000e+00> : vector<32x128xf32>
    %39 = tpu.matmul %36, %38, %cst_21 {dimension_numbers = #tpu.dot_dimension_numbers<[1], [0], [0], [1], [0, 0, 1, 1], [], []>} : vector<32x64xbf16>, vector<64x128xbf16>, vector<32x128xf32> -> vector<32x128xf32>
    %40 = arith.addf %35, %39 : vector<32x128xf32>
    %41 = vector.extract_strided_slice %34 {offsets = [32, 0], sizes = [32, 64], strides = [1, 1]} : vector<512x64xbf16> to vector<32x64xbf16>
    %c1 = arith.constant 1 : index
    %c0_22 = arith.constant 0 : index
    %c0_23 = arith.constant 0 : index
    %42 = vector.load %arg6[%c1, %c0_22, %c0_23] : memref<16x64x128xbf16, #tpu.memory_space<vmem>>, vector<1x64x128xbf16>
    %43 = vector.shape_cast %42 : vector<1x64x128xbf16> to vector<64x128xbf16>
    %cst_24 = arith.constant dense<0.000000e+00> : vector<32x128xf32>
    %44 = tpu.matmul %41, %43, %cst_24 {dimension_numbers = #tpu.dot_dimension_numbers<[1], [0], [0], [1], [0, 0, 1, 1], [], []>} : vector<32x64xbf16>, vector<64x128xbf16>, vector<32x128xf32> -> vector<32x128xf32>
    %45 = arith.addf %40, %44 : vector<32x128xf32>
    %46 = vector.extract_strided_slice %34 {offsets = [64, 0], sizes = [32, 64], strides = [1, 1]} : vector<512x64xbf16> to vector<32x64xbf16>
    %c2 = arith.constant 2 : index
    %c0_25 = arith.constant 0 : index
    %c0_26 = arith.constant 0 : index
    %47 = vector.load %arg6[%c2, %c0_25, %c0_26] : memref<16x64x128xbf16, #tpu.memory_space<vmem>>, vector<1x64x128xbf16>
    %48 = vector.shape_cast %47 : vector<1x64x128xbf16> to vector<64x128xbf16>
    %cst_27 = arith.constant dense<0.000000e+00> : vector<32x128xf32>
    %49 = tpu.matmul %46, %48, %cst_27 {dimension_numbers = #tpu.dot_dimension_numbers<[1], [0], [0], [1], [0, 0, 1, 1], [], []>} : vector<32x64xbf16>, vector<64x128xbf16>, vector<32x128xf32> -> vector<32x128xf32>
    %50 = arith.addf %45, %49 : vector<32x128xf32>
    %51 = vector.extract_strided_slice %34 {offsets = [96, 0], sizes = [32, 64], strides = [1, 1]} : vector<512x64xbf16> to vector<32x64xbf16>
    %c3 = arith.constant 3 : index
    %c0_28 = arith.constant 0 : index
    %c0_29 = arith.constant 0 : index
    %52 = vector.load %arg6[%c3, %c0_28, %c0_29] : memref<16x64x128xbf16, #tpu.memory_space<vmem>>, vector<1x64x128xbf16>
    %53 = vector.shape_cast %52 : vector<1x64x128xbf16> to vector<64x128xbf16>
    %cst_30 = arith.constant dense<0.000000e+00> : vector<32x128xf32>
    %54 = tpu.matmul %51, %53, %cst_30 {dimension_numbers = #tpu.dot_dimension_numbers<[1], [0], [0], [1], [0, 0, 1, 1], [], []>} : vector<32x64xbf16>, vector<64x128xbf16>, vector<32x128xf32> -> vector<32x128xf32>
    %55 = arith.addf %50, %54 : vector<32x128xf32>
    %56 = vector.extract_strided_slice %34 {offsets = [128, 0], sizes = [32, 64], strides = [1, 1]} : vector<512x64xbf16> to vector<32x64xbf16>
    %c4 = arith.constant 4 : index
    %c0_31 = arith.constant 0 : index
    %c0_32 = arith.constant 0 : index
    %57 = vector.load %arg6[%c4, %c0_31, %c0_32] : memref<16x64x128xbf16, #tpu.memory_space<vmem>>, vector<1x64x128xbf16>
    %58 = vector.shape_cast %57 : vector<1x64x128xbf16> to vector<64x128xbf16>
    %cst_33 = arith.constant dense<0.000000e+00> : vector<32x128xf32>
    %59 = tpu.matmul %56, %58, %cst_33 {dimension_numbers = #tpu.dot_dimension_numbers<[1], [0], [0], [1], [0, 0, 1, 1], [], []>} : vector<32x64xbf16>, vector<64x128xbf16>, vector<32x128xf32> -> vector<32x128xf32>
    %60 = arith.addf %55, %59 : vector<32x128xf32>
    %61 = vector.extract_strided_slice %34 {offsets = [160, 0], sizes = [32, 64], strides = [1, 1]} : vector<512x64xbf16> to vector<32x64xbf16>
    %c5 = arith.constant 5 : index
    %c0_34 = arith.constant 0 : index
    %c0_35 = arith.constant 0 : index
    %62 = vector.load %arg6[%c5, %c0_34, %c0_35] : memref<16x64x128xbf16, #tpu.memory_space<vmem>>, vector<1x64x128xbf16>
    %63 = vector.shape_cast %62 : vector<1x64x128xbf16> to vector<64x128xbf16>
    %cst_36 = arith.constant dense<0.000000e+00> : vector<32x128xf32>
    %64 = tpu.matmul %61, %63, %cst_36 {dimension_numbers = #tpu.dot_dimension_numbers<[1], [0], [0], [1], [0, 0, 1, 1], [], []>} : vector<32x64xbf16>, vector<64x128xbf16>, vector<32x128xf32> -> vector<32x128xf32>
    %65 = arith.addf %60, %64 : vector<32x128xf32>
    %66 = vector.extract_strided_slice %34 {offsets = [192, 0], sizes = [32, 64], strides = [1, 1]} : vector<512x64xbf16> to vector<32x64xbf16>
    %c6 = arith.constant 6 : index
    %c0_37 = arith.constant 0 : index
    %c0_38 = arith.constant 0 : index
    %67 = vector.load %arg6[%c6, %c0_37, %c0_38] : memref<16x64x128xbf16, #tpu.memory_space<vmem>>, vector<1x64x128xbf16>
    %68 = vector.shape_cast %67 : vector<1x64x128xbf16> to vector<64x128xbf16>
    %cst_39 = arith.constant dense<0.000000e+00> : vector<32x128xf32>
    %69 = tpu.matmul %66, %68, %cst_39 {dimension_numbers = #tpu.dot_dimension_numbers<[1], [0], [0], [1], [0, 0, 1, 1], [], []>} : vector<32x64xbf16>, vector<64x128xbf16>, vector<32x128xf32> -> vector<32x128xf32>
    %70 = arith.addf %65, %69 : vector<32x128xf32>
    %71 = vector.extract_strided_slice %34 {offsets = [224, 0], sizes = [32, 64], strides = [1, 1]} : vector<512x64xbf16> to vector<32x64xbf16>
    %c7 = arith.constant 7 : index
    %c0_40 = arith.constant 0 : index
    %c0_41 = arith.constant 0 : index
    %72 = vector.load %arg6[%c7, %c0_40, %c0_41] : memref<16x64x128xbf16, #tpu.memory_space<vmem>>, vector<1x64x128xbf16>
    %73 = vector.shape_cast %72 : vector<1x64x128xbf16> to vector<64x128xbf16>
    %cst_42 = arith.constant dense<0.000000e+00> : vector<32x128xf32>
    %74 = tpu.matmul %71, %73, %cst_42 {dimension_numbers = #tpu.dot_dimension_numbers<[1], [0], [0], [1], [0, 0, 1, 1], [], []>} : vector<32x64xbf16>, vector<64x128xbf16>, vector<32x128xf32> -> vector<32x128xf32>
    %75 = arith.addf %70, %74 : vector<32x128xf32>
    %76 = vector.extract_strided_slice %34 {offsets = [256, 0], sizes = [32, 64], strides = [1, 1]} : vector<512x64xbf16> to vector<32x64xbf16>
    %c8 = arith.constant 8 : index
    %c0_43 = arith.constant 0 : index
    %c0_44 = arith.constant 0 : index
    %77 = vector.load %arg6[%c8, %c0_43, %c0_44] : memref<16x64x128xbf16, #tpu.memory_space<vmem>>, vector<1x64x128xbf16>
    %78 = vector.shape_cast %77 : vector<1x64x128xbf16> to vector<64x128xbf16>
    %cst_45 = arith.constant dense<0.000000e+00> : vector<32x128xf32>
    %79 = tpu.matmul %76, %78, %cst_45 {dimension_numbers = #tpu.dot_dimension_numbers<[1], [0], [0], [1], [0, 0, 1, 1], [], []>} : vector<32x64xbf16>, vector<64x128xbf16>, vector<32x128xf32> -> vector<32x128xf32>
    %80 = arith.addf %75, %79 : vector<32x128xf32>
    %81 = vector.extract_strided_slice %34 {offsets = [288, 0], sizes = [32, 64], strides = [1, 1]} : vector<512x64xbf16> to vector<32x64xbf16>
    %c9 = arith.constant 9 : index
    %c0_46 = arith.constant 0 : index
    %c0_47 = arith.constant 0 : index
    %82 = vector.load %arg6[%c9, %c0_46, %c0_47] : memref<16x64x128xbf16, #tpu.memory_space<vmem>>, vector<1x64x128xbf16>
    %83 = vector.shape_cast %82 : vector<1x64x128xbf16> to vector<64x128xbf16>
    %cst_48 = arith.constant dense<0.000000e+00> : vector<32x128xf32>
    %84 = tpu.matmul %81, %83, %cst_48 {dimension_numbers = #tpu.dot_dimension_numbers<[1], [0], [0], [1], [0, 0, 1, 1], [], []>} : vector<32x64xbf16>, vector<64x128xbf16>, vector<32x128xf32> -> vector<32x128xf32>
    %85 = arith.addf %80, %84 : vector<32x128xf32>
    %86 = vector.extract_strided_slice %34 {offsets = [320, 0], sizes = [32, 64], strides = [1, 1]} : vector<512x64xbf16> to vector<32x64xbf16>
    %c10 = arith.constant 10 : index
    %c0_49 = arith.constant 0 : index
    %c0_50 = arith.constant 0 : index
    %87 = vector.load %arg6[%c10, %c0_49, %c0_50] : memref<16x64x128xbf16, #tpu.memory_space<vmem>>, vector<1x64x128xbf16>
    %88 = vector.shape_cast %87 : vector<1x64x128xbf16> to vector<64x128xbf16>
    %cst_51 = arith.constant dense<0.000000e+00> : vector<32x128xf32>
    %89 = tpu.matmul %86, %88, %cst_51 {dimension_numbers = #tpu.dot_dimension_numbers<[1], [0], [0], [1], [0, 0, 1, 1], [], []>} : vector<32x64xbf16>, vector<64x128xbf16>, vector<32x128xf32> -> vector<32x128xf32>
    %90 = arith.addf %85, %89 : vector<32x128xf32>
    %91 = vector.extract_strided_slice %34 {offsets = [352, 0], sizes = [32, 64], strides = [1, 1]} : vector<512x64xbf16> to vector<32x64xbf16>
    %c11 = arith.constant 11 : index
    %c0_52 = arith.constant 0 : index
    %c0_53 = arith.constant 0 : index
    %92 = vector.load %arg6[%c11, %c0_52, %c0_53] : memref<16x64x128xbf16, #tpu.memory_space<vmem>>, vector<1x64x128xbf16>
    %93 = vector.shape_cast %92 : vector<1x64x128xbf16> to vector<64x128xbf16>
    %cst_54 = arith.constant dense<0.000000e+00> : vector<32x128xf32>
    %94 = tpu.matmul %91, %93, %cst_54 {dimension_numbers = #tpu.dot_dimension_numbers<[1], [0], [0], [1], [0, 0, 1, 1], [], []>} : vector<32x64xbf16>, vector<64x128xbf16>, vector<32x128xf32> -> vector<32x128xf32>
    %95 = arith.addf %90, %94 : vector<32x128xf32>
    %96 = vector.extract_strided_slice %34 {offsets = [384, 0], sizes = [32, 64], strides = [1, 1]} : vector<512x64xbf16> to vector<32x64xbf16>
    %c12 = arith.constant 12 : index
    %c0_55 = arith.constant 0 : index
    %c0_56 = arith.constant 0 : index
    %97 = vector.load %arg6[%c12, %c0_55, %c0_56] : memref<16x64x128xbf16, #tpu.memory_space<vmem>>, vector<1x64x128xbf16>
    %98 = vector.shape_cast %97 : vector<1x64x128xbf16> to vector<64x128xbf16>
    %cst_57 = arith.constant dense<0.000000e+00> : vector<32x128xf32>
    %99 = tpu.matmul %96, %98, %cst_57 {dimension_numbers = #tpu.dot_dimension_numbers<[1], [0], [0], [1], [0, 0, 1, 1], [], []>} : vector<32x64xbf16>, vector<64x128xbf16>, vector<32x128xf32> -> vector<32x128xf32>
    %100 = arith.addf %95, %99 : vector<32x128xf32>
    %101 = vector.extract_strided_slice %34 {offsets = [416, 0], sizes = [32, 64], strides = [1, 1]} : vector<512x64xbf16> to vector<32x64xbf16>
    %c13 = arith.constant 13 : index
    %c0_58 = arith.constant 0 : index
    %c0_59 = arith.constant 0 : index
    %102 = vector.load %arg6[%c13, %c0_58, %c0_59] : memref<16x64x128xbf16, #tpu.memory_space<vmem>>, vector<1x64x128xbf16>
    %103 = vector.shape_cast %102 : vector<1x64x128xbf16> to vector<64x128xbf16>
    %cst_60 = arith.constant dense<0.000000e+00> : vector<32x128xf32>
    %104 = tpu.matmul %101, %103, %cst_60 {dimension_numbers = #tpu.dot_dimension_numbers<[1], [0], [0], [1], [0, 0, 1, 1], [], []>} : vector<32x64xbf16>, vector<64x128xbf16>, vector<32x128xf32> -> vector<32x128xf32>
    %105 = arith.addf %100, %104 : vector<32x128xf32>
    %106 = vector.extract_strided_slice %34 {offsets = [448, 0], sizes = [32, 64], strides = [1, 1]} : vector<512x64xbf16> to vector<32x64xbf16>
    %c14 = arith.constant 14 : index
    %c0_61 = arith.constant 0 : index
    %c0_62 = arith.constant 0 : index
    %107 = vector.load %arg6[%c14, %c0_61, %c0_62] : memref<16x64x128xbf16, #tpu.memory_space<vmem>>, vector<1x64x128xbf16>
    %108 = vector.shape_cast %107 : vector<1x64x128xbf16> to vector<64x128xbf16>
    %cst_63 = arith.constant dense<0.000000e+00> : vector<32x128xf32>
    %109 = tpu.matmul %106, %108, %cst_63 {dimension_numbers = #tpu.dot_dimension_numbers<[1], [0], [0], [1], [0, 0, 1, 1], [], []>} : vector<32x64xbf16>, vector<64x128xbf16>, vector<32x128xf32> -> vector<32x128xf32>
    %110 = arith.addf %105, %109 : vector<32x128xf32>
    %111 = vector.extract_strided_slice %34 {offsets = [480, 0], sizes = [32, 64], strides = [1, 1]} : vector<512x64xbf16> to vector<32x64xbf16>
    %c15 = arith.constant 15 : index
    %c0_64 = arith.constant 0 : index
    %c0_65 = arith.constant 0 : index
    %112 = vector.load %arg6[%c15, %c0_64, %c0_65] : memref<16x64x128xbf16, #tpu.memory_space<vmem>>, vector<1x64x128xbf16>
    %113 = vector.shape_cast %112 : vector<1x64x128xbf16> to vector<64x128xbf16>
    %cst_66 = arith.constant dense<0.000000e+00> : vector<32x128xf32>
    %114 = tpu.matmul %111, %113, %cst_66 {dimension_numbers = #tpu.dot_dimension_numbers<[1], [0], [0], [1], [0, 0, 1, 1], [], []>} : vector<32x64xbf16>, vector<64x128xbf16>, vector<32x128xf32> -> vector<32x128xf32>
    %115 = arith.addf %110, %114 : vector<32x128xf32>
    %cst_67 = arith.constant dense<0.000000e+00> : vector<128xf32>
    %116 = vector.multi_reduction <add>, %115, %cst_67 [0] : vector<32x128xf32> to vector<128xf32>
    %117 = vector.shape_cast %116 : vector<128xf32> to vector<1x128xf32>
    %cst_68 = arith.constant 3.125000e-02 : f32
    %118 = vector.broadcast %cst_68 : f32 to vector<1x128xf32>
    %119 = arith.mulf %117, %118 : vector<1x128xf32>
    %120 = arith.mulf %115, %115 : vector<32x128xf32>
    %cst_69 = arith.constant dense<0.000000e+00> : vector<128xf32>
    %121 = vector.multi_reduction <add>, %120, %cst_69 [0] : vector<32x128xf32> to vector<128xf32>
    %122 = vector.shape_cast %121 : vector<128xf32> to vector<1x128xf32>
    %cst_70 = arith.constant 3.125000e-02 : f32
    %123 = vector.broadcast %cst_70 : f32 to vector<1x128xf32>
    %124 = arith.mulf %122, %123 : vector<1x128xf32>
    %125 = arith.mulf %119, %119 : vector<1x128xf32>
    %126 = arith.subf %124, %125 : vector<1x128xf32>
    %c0_71 = arith.constant 0 : index
    %c0_72 = arith.constant 0 : index
    %127 = vector.load %arg7[%c0_71, %c0_72] : memref<1x128xf32, #tpu.memory_space<vmem>>, vector<1x128xf32>
    %cst_73 = arith.constant 9.99999974E-6 : f32
    %128 = vector.broadcast %cst_73 : f32 to vector<1x128xf32>
    %129 = arith.addf %126, %128 : vector<1x128xf32>
    %130 = math.rsqrt %129 : vector<1x128xf32>
    %131 = arith.mulf %127, %130 : vector<1x128xf32>
    %c0_74 = arith.constant 0 : index
    %c0_75 = arith.constant 0 : index
    %132 = vector.load %arg8[%c0_74, %c0_75] : memref<1x128xf32, #tpu.memory_space<vmem>>, vector<1x128xf32>
    %133 = arith.mulf %119, %131 : vector<1x128xf32>
    %134 = arith.subf %132, %133 : vector<1x128xf32>
    %135 = vector.broadcast %131 : vector<1x128xf32> to vector<32x128xf32>
    %136 = arith.mulf %115, %135 : vector<32x128xf32>
    %137 = vector.broadcast %134 : vector<1x128xf32> to vector<32x128xf32>
    %138 = arith.addf %136, %137 : vector<32x128xf32>
    %cst_76 = arith.constant 0.000000e+00 : f32
    %139 = vector.broadcast %cst_76 : f32 to vector<32x128xf32>
    %140 = arith.cmpf ogt, %138, %139 : vector<32x128xf32>
    %cst_77 = arith.constant 2.000000e-01 : f32
    %141 = vector.broadcast %cst_77 : f32 to vector<32x128xf32>
    %142 = arith.mulf %141, %138 : vector<32x128xf32>
    %143 = arith.select %140, %138, %142 : vector<32x128xi1>, vector<32x128xf32>
    %c0_78 = arith.constant 0 : index
    %c0_79 = arith.constant 0 : index
    %144 = vector.load %arg9[%c0_78, %c0_79] : memref<32x128xf32, #tpu.memory_space<vmem>>, vector<32x128xf32>
    %145 = arith.mulf %143, %144 : vector<32x128xf32>
    %cst_80 = arith.constant dense<0.000000e+00> : vector<32xf32>
    %146 = vector.multi_reduction <add>, %145, %cst_80 [1] : vector<32x128xf32> to vector<32xf32>
    %147 = vector.shape_cast %146 : vector<32xf32> to vector<32x1xf32>
    %c0_81 = arith.constant 0 : index
    %c0_82 = arith.constant 0 : index
    %148 = vector.load %arg10[%c0_81, %c0_82] : memref<2x32xf32, #tpu.memory_space<vmem>>, vector<2x32xf32>
    %cst_83 = arith.constant dense<0.000000e+00> : vector<2x1xf32>
    %149 = tpu.matmul %148, %147, %cst_83 {dimension_numbers = #tpu.dot_dimension_numbers<[1], [0], [0], [1], [0, 0, 1, 1], [], []>} : vector<2x32xf32>, vector<32x1xf32>, vector<2x1xf32> -> vector<2x1xf32>
    %c0_84 = arith.constant 0 : index
    %c0_85 = arith.constant 0 : index
    %150 = vector.load %arg11[%c0_84, %c0_85] : memref<1x1xf32, #tpu.memory_space<vmem>>, vector<1x1xf32>
    %151 = vector.broadcast %150 : vector<1x1xf32> to vector<2x1xf32>
    %152 = arith.addf %149, %151 : vector<2x1xf32>
    %c0_86 = arith.constant 0 : index
    %c0_87 = arith.constant 0 : index
    %153 = vector.load %arg12[%c0_86, %c0_87] : memref<2x1xf32, #tpu.memory_space<vmem>>, vector<2x1xf32>
    tpu.vector_store %arg12[%c0_86, %c0_87], %152 {strides = array<i32>} : memref<2x1xf32, #tpu.memory_space<vmem>>, vector<2x1xf32>,
    return
  }
  func.func @transform_0(%arg0: i32) -> (i32, i32) {
    %c0_i32 = arith.constant 0 : i32
    %c0_i32_0 = arith.constant 0 : i32
    %c0_i32_1 = arith.constant 0 : i32
    return %c0_i32, %c0_i32_0 : i32, i32
  }
  func.func @transform_1(%arg0: i32) -> (i32, i32) {
    %c0_i32 = arith.constant 0 : i32
    %c0_i32_0 = arith.constant 0 : i32
    %c0_i32_1 = arith.constant 0 : i32
    return %c0_i32, %c0_i32_0 : i32, i32
  }
  func.func @transform_2(%arg0: i32) -> (i32, i32) {
    %c0_i32 = arith.constant 0 : i32
    %c0_i32_0 = arith.constant 0 : i32
    %c0_i32_1 = arith.constant 0 : i32
    return %c0_i32, %c0_i32_0 : i32, i32
  }
  func.func @transform_3(%arg0: i32) -> (i32, i32) {
    %c0_i32 = arith.constant 0 : i32
    %c0_i32_0 = arith.constant 0 : i32
    %c0_i32_1 = arith.constant 0 : i32
    return %c0_i32, %c0_i32_0 : i32, i32
  }
  func.func @transform_4(%arg0: i32) -> (i32, i32) {
    %c0_i32 = arith.constant 0 : i32
    %c0_i32_0 = arith.constant 0 : i32
    %c0_i32_1 = arith.constant 0 : i32
    return %c0_i32, %c0_i32_0 : i32, i32
  }
  func.func @transform_5(%arg0: i32) -> (i32, i32, i32) {
    %c0_i32 = arith.constant 0 : i32
    %c0_i32_0 = arith.constant 0 : i32
    %c0_i32_1 = arith.constant 0 : i32
    %c0_i32_2 = arith.constant 0 : i32
    return %c0_i32, %c0_i32_0, %c0_i32_1 : i32, i32, i32
  }
  func.func @transform_6(%arg0: i32) -> (i32, i32) {
    %c0_i32 = arith.constant 0 : i32
    %c0_i32_0 = arith.constant 0 : i32
    %c0_i32_1 = arith.constant 0 : i32
    return %c0_i32, %c0_i32_0 : i32, i32
  }
  func.func @transform_7(%arg0: i32) -> (i32, i32) {
    %c0_i32 = arith.constant 0 : i32
    %c0_i32_0 = arith.constant 0 : i32
    %c0_i32_1 = arith.constant 0 : i32
    return %c0_i32, %c0_i32_0 : i32, i32
  }
  func.func @transform_8(%arg0: i32) -> (i32, i32) {
    %c0_i32 = arith.constant 0 : i32
    %c0_i32_0 = arith.constant 0 : i32
    %c0_i32_1 = arith.constant 0 : i32
    return %c0_i32, %c0_i32_0 : i32, i32
  }
  func.func @transform_9(%arg0: i32) -> (i32, i32) {
    %c0_i32 = arith.constant 0 : i32
    %c0_i32_0 = arith.constant 0 : i32
    %c0_i32_1 = arith.constant 0 : i32
    return %c0_i32, %c0_i32_0 : i32, i32
  }
  func.func @transform_10(%arg0: i32) -> (i32, i32) {
    %c0_i32 = arith.constant 0 : i32
    %c0_i32_0 = arith.constant 0 : i32
    %c0_i32_1 = arith.constant 0 : i32
    return %c0_i32, %c0_i32_0 : i32, i32
  }
  func.func @transform_11(%arg0: i32) -> (i32, i32) {
    %c0_i32 = arith.constant 0 : i32
    %c0_i32_0 = arith.constant 0 : i32
    %c0_i32_1 = arith.constant 0 : i32
    return %c0_i32, %c0_i32_0 : i32, i32
  }
}

</mosaic_0001>

<bundles_post_ra>
// kernel: squeeze.1
= control target key start
LH: loop header
LB: loop body
LE: loop exit
PB: predicated region body
PF: predicated region fallthrough
CT: control target
= control target key end

     0   :  { %vm3_vm0 = vcmask 130048   ;;  %s178_s10 = smov 112   ;;  %s179_s19 = smov 80   ;;  %s328_s0 = inlined_call_operand.vmem [shape: f32[2048], index: 0, kind: input, shape index: {}]   ;;  %s329_s1 = inlined_call_operand.vmem [shape: f32[128,16], index: 1, kind: output, shape index: {}]  }
   0x1   :  { %v30_v0 = vld [vmem:[%s328_s0] sm:$0xff]   ;;  %v142_v1 = vld [vmem:[%s328_s0 + $0x8] sm:$0xff]   ;;  %s177_s0 = smov 96   ;;  %s180_s20 = smov 64  }
   0x2   :  { %31 = vrot.lane.b32.xlu1 %v30_v0, %s177_s0  ;;  %14 = vrot.lane.b32.xlu0 %v30_v0, %s178_s10  ;;  %4 = vst.msk [vmem:[%s329_s1] ss:$8 sm:$0xf] %vm3_vm0, %v30_v0   ;;  %5 = vst.msk [vmem:[%s329_s1] ss:$8 sm:$0xf0] %vm3_vm0, %v30_v0  }
   0x3   :  { %133 = vst.msk [vmem:[%s329_s1 + $0x40] ss:$8 sm:$0xf] %vm3_vm0, %v142_v1   ;;  %134 = vst.msk [vmem:[%s329_s1 + $0x40] ss:$8 sm:$0xf0] %vm3_vm0, %v142_v1  }
   0x4   :  { %s181_s21 = smov 48   ;;  %s182_s22 = smov 32  }
   0x5   :  { %s183_s23 = smov 16  }
   0x6   :  { %40 = vrot.lane.b32.xlu1 %v142_v1, %s177_s0  ;;  %23 = vrot.lane.b32.xlu0 %v142_v1, %s178_s10 }
   0xa   :  { %57 = vrot.lane.b32.xlu1 %v142_v1, %s179_s19  ;;  %48 = vrot.lane.b32.xlu0 %v30_v0, %s179_s19 }
   0xe   :  { %74 = vrot.lane.b32.xlu1 %v142_v1, %s180_s20  ;;  %65 = vrot.lane.b32.xlu0 %v30_v0, %s180_s20 }
  0x12   :  { %91 = vrot.lane.b32.xlu1 %v142_v1, %s181_s21  ;;  %82 = vrot.lane.b32.xlu0 %v30_v0, %s181_s21 }
  0x16   :  { %108 = vrot.lane.b32.xlu1 %v142_v1, %s182_s22  ;;  %99 = vrot.lane.b32.xlu0 %v30_v0, %s182_s22 }
  0x1a   :  { %125 = vrot.lane.b32.xlu1 %v142_v1, %s183_s23  ;;  %116 = vrot.lane.b32.xlu0 %v30_v0, %s183_s23 }
  0x74   :  { %v32_v2 = vpop.permute.xlu1 %31   ;;  %v15_v3 = vpop.permute.xlu0 %14  }
  0x75   :  { %140 = vst.msk [vmem:[%s329_s1 + $0x2] ss:$8 sm:$0xf] %vm3_vm0, %v32_v2   ;;  %141 = vst.msk [vmem:[%s329_s1 + $0x2] ss:$8 sm:$0xf0] %vm3_vm0, %v32_v2  }
  0x76   :  { %135 = vst.msk [vmem:[%s329_s1 + $0x1] ss:$8 sm:$0xf] %vm3_vm0, %v15_v3   ;;  %136 = vst.msk [vmem:[%s329_s1 + $0x1] ss:$8 sm:$0xf0] %vm3_vm0, %v15_v3  }
  0x78   :  { %v41_v4 = vpop.permute.xlu1 %40   ;;  %v24_v5 = vpop.permute.xlu0 %23  }
  0x79   :  { %143 = vst.msk [vmem:[%s329_s1 + $0x42] ss:$8 sm:$0xf] %vm3_vm0, %v41_v4   ;;  %144 = vst.msk [vmem:[%s329_s1 + $0x42] ss:$8 sm:$0xf0] %vm3_vm0, %v41_v4  }
  0x7a   :  { %138 = vst.msk [vmem:[%s329_s1 + $0x41] ss:$8 sm:$0xf] %vm3_vm0, %v24_v5   ;;  %139 = vst.msk [vmem:[%s329_s1 + $0x41] ss:$8 sm:$0xf0] %vm3_vm0, %v24_v5  }
  0x7c   :  { %v58_v6 = vpop.permute.xlu1 %57   ;;  %v49_v7 = vpop.permute.xlu0 %48  }
  0x7d   :  { %148 = vst.msk [vmem:[%s329_s1 + $0x43] ss:$8 sm:$0xf] %vm3_vm0, %v58_v6   ;;  %149 = vst.msk [vmem:[%s329_s1 + $0x43] ss:$8 sm:$0xf0] %vm3_vm0, %v58_v6  }
  0x7e   :  { %145 = vst.msk [vmem:[%s329_s1 + $0x3] ss:$8 sm:$0xf] %vm3_vm0, %v49_v7   ;;  %146 = vst.msk [vmem:[%s329_s1 + $0x3] ss:$8 sm:$0xf0] %vm3_vm0, %v49_v7  }
  0x80   :  { %v75_v8 = vpop.permute.xlu1 %74   ;;  %v66_v9 = vpop.permute.xlu0 %65  }
  0x81   :  { %153 = vst.msk [vmem:[%s329_s1 + $0x44] ss:$8 sm:$0xf] %vm3_vm0, %v75_v8   ;;  %154 = vst.msk [vmem:[%s329_s1 + $0x44] ss:$8 sm:$0xf0] %vm3_vm0, %v75_v8  }
  0x82   :  { %150 = vst.msk [vmem:[%s329_s1 + $0x4] ss:$8 sm:$0xf] %vm3_vm0, %v66_v9   ;;  %151 = vst.msk [vmem:[%s329_s1 + $0x4] ss:$8 sm:$0xf0] %vm3_vm0, %v66_v9  }
  0x84   :  { %v92_v10 = vpop.permute.xlu1 %91   ;;  %v83_v11 = vpop.permute.xlu0 %82  }
  0x85   :  { %158 = vst.msk [vmem:[%s329_s1 + $0x45] ss:$8 sm:$0xf] %vm3_vm0, %v92_v10   ;;  %159 = vst.msk [vmem:[%s329_s1 + $0x45] ss:$8 sm:$0xf0] %vm3_vm0, %v92_v10  }
  0x86   :  { %155 = vst.msk [vmem:[%s329_s1 + $0x5] ss:$8 sm:$0xf] %vm3_vm0, %v83_v11   ;;  %156 = vst.msk [vmem:[%s329_s1 + $0x5] ss:$8 sm:$0xf0] %vm3_vm0, %v83_v11  }
  0x88   :  { %v109_v12 = vpop.permute.xlu1 %108   ;;  %v100_v13 = vpop.permute.xlu0 %99  }
  0x89   :  { %163 = vst.msk [vmem:[%s329_s1 + $0x46] ss:$8 sm:$0xf] %vm3_vm0, %v109_v12   ;;  %164 = vst.msk [vmem:[%s329_s1 + $0x46] ss:$8 sm:$0xf0] %vm3_vm0, %v109_v12  }
  0x8a   :  { %160 = vst.msk [vmem:[%s329_s1 + $0x6] ss:$8 sm:$0xf] %vm3_vm0, %v100_v13   ;;  %161 = vst.msk [vmem:[%s329_s1 + $0x6] ss:$8 sm:$0xf0] %vm3_vm0, %v100_v13  }
  0x8c   :  { %v126_v14 = vpop.permute.xlu1 %125   ;;  %v117_v15 = vpop.permute.xlu0 %116  }
  0x8d   :  { %168 = vst.msk [vmem:[%s329_s1 + $0x47] ss:$8 sm:$0xf] %vm3_vm0, %v126_v14   ;;  %169 = vst.msk [vmem:[%s329_s1 + $0x47] ss:$8 sm:$0xf0] %vm3_vm0, %v126_v14  }
  0x8e   :  { %165 = vst.msk [vmem:[%s329_s1 + $0x7] ss:$8 sm:$0xf] %vm3_vm0, %v117_v15   ;;  %166 = vst.msk [vmem:[%s329_s1 + $0x7] ss:$8 sm:$0xf0] %vm3_vm0, %v117_v15  }

// kernel: discriminator_forward.1
= control target key start
LH: loop header
LB: loop body
LE: loop exit
PB: predicated region body
PF: predicated region fallthrough
CT: control target
= control target key end

     0   :  { %vm105_vm0 = vcmask 130048   ;;  %vm227_vm1 = vcmask 523264   ;;  %s4289_s1 = inlined_call_operand.vmem [shape: bf16[16,64], index: 1, kind: input, shape index: {}]   ;;  %s4290_s0 = inlined_call_operand.vmem [shape: bf16[128,16], index: 0, kind: input, shape index: {}]   ;;  %s4291_s4 = inlined_call_operand.vmem [shape: bf16[512,128], index: 4, kind: input, shape index: {}]   ;;  %s4292_s2 = inlined_call_operand.vmem [shape: f32[1,64], index: 2, kind: input, shape index: {}]   ;;  %s4293_s3 = inlined_call_operand.vmem [shape: f32[1,64], index: 3, kind: input, shape index: {}]   ;;  %s4294_s5 = inlined_call_operand.vmem [shape: bf16[16,64,128], index: 5, kind: input, shape index: {}]   ;;  %s4295_s6 = inlined_call_operand.vmem [shape: f32[1,128], index: 6, kind: input, shape index: {}]   ;;  %s4296_s7 = inlined_call_operand.vmem [shape: f32[1,128], index: 7, kind: input, shape index: {}]   ;;  %s4297_s8 = inlined_call_operand.vmem [shape: f32[32,128], index: 8, kind: input, shape index: {}]   ;;  %s4298_s10 = inlined_call_operand.<no memory space> [shape: f32[1,1], index: 10, kind: input, shape index: {}]   ;;  %s4299_s9 = inlined_call_operand.vmem [shape: f32[2,32], index: 9, kind: input, shape index: {}]   ;;  %s4300_s11 = inlined_call_operand.vmem [shape: f32[2,1], index: 11, kind: output, shape index: {}]  }
   0x1   :  { %v3425_v0 = vld [vmem:[%s4289_s1] sm:$0xff]   ;;  %v3427_v2 = vld [vmem:[%s4290_s0 + $0x8] sm:$0xff]   ;;  %v3428_v3 = vld [vmem:[%s4290_s0 + $0x10] sm:$0xff]  }
   0x2   :  { %v3426_v1 = vld [vmem:[%s4290_s0] sm:$0xff]   ;;  %3055 = vmatprep.subr.bf16.mxu1 %v3425_v0  ;;  %v3429_v4 = vld [vmem:[%s4290_s0 + $0x18] sm:$0xff]   ;;  %v3431_v6 = vld [vmem:[%s4290_s0 + $0x28] sm:$0xff]  }
   0x3   :  { %3056 = vmatpush3.bf16.msra.mxu1 %v3425_v0  ;;  %3057 = vmatprep.mubr.msk.bf16.mxu1 %vm105_vm0, %v3426_v1  ;;  %v3430_v5 = vld [vmem:[%s4290_s0 + $0x20] sm:$0xff]   ;;  %v3432_v7 = vld [vmem:[%s4290_s0 + $0x30] sm:$0xff]   ;;  %v3433_v8 = vld [vmem:[%s4290_s0 + $0x38] sm:$0xff]  }
   0x4   :  { %v3434_v9 = vld [vmem:[%s4291_s4] sm:$0xff]  }
   0x6   :  { %3058 = vmatmul.mubr.msk.bf16.vlgmr.msra.gmra.mrb[0].mxu1 %vm105_vm0, %v3427_v2 }
   0x7   :  { %3061 = vmatprep.mubr.msk.bf16.mxu1 %vm105_vm0, %v3428_v3 }
   0xe   :  { %3062 = vmatmul.mubr.msk.bf16.gmra.mrb[4].mxu1 %vm105_vm0, %v3429_v4 }
   0xf   :  { %3065 = vmatprep.mubr.msk.bf16.mxu1 %vm105_vm0, %v3430_v5 }
  0x16   :  { %3066 = vmatmul.mubr.msk.bf16.gmra.mrb[8].mxu1 %vm105_vm0, %v3431_v6 }
  0x17   :  { %3069 = vmatprep.mubr.msk.bf16.mxu1 %vm105_vm0, %v3432_v7 }
  0x1e   :  { %3070 = vmatmul.mubr.msk.bf16.gmra.mrb[12].mxu1 %vm105_vm0, %v3433_v8 }
  0x1f   :  { %3089 = vmatprep.mubr.bf16.mxu1 %v3434_v9 }
  0xd9   :  { %v3635_v10 = vpop.f32.mrb[0].mxu1 }
  0xda   :  { %v268_v11 = vmul.f32 %v3635_v10, %v3635_v10  ;;  %v3639_v12 = vpop.f32.mrb[1].mxu1  ;;  %v231_v19 = vsel %vm227_vm1, %v3635_v10, 0.0 }
  0xdb   :  { %v266_v13 = vmul.f32 %v3639_v12, %v3639_v12  ;;  %v3643_v14 = vpop.f32.mrb[2].mxu1  ;;  %v228_v16 = vsel %vm227_vm1, %v3639_v12, 0.0 }
  0xdc   :  { %v3645_v15 = vpop.f32.mrb[3].mxu1  ;;  %v285_v20 = vsel %vm227_vm1, %v268_v11, 0.0  ;;  %v269_v23 = vmul.f32 %v3643_v14, %v3643_v14  ;;  %v233_v27 = vsel %vm227_vm1, %v3643_v14, 0.0 }
  0xdd   :  { %v229_v17 = vsel %vm227_vm1, %v3645_v15, 0.0  ;;  %v267_v18 = vmul.f32 %v3645_v15, %v3645_v15  ;;  %v282_v22 = vsel %vm227_vm1, %v266_v13, 0.0 }
  0xde   :  { %v230_v21 = vadd.f32 %v229_v17, %v228_v16  ;;  %v287_v32 = vsel %vm227_vm1, %v269_v23, 0.0 }
  0xdf   :  { %v283_v24 = vsel %vm227_vm1, %v267_v18, 0.0 }
  0xe0   :  { %v232_v25 = vadd.f32 %v231_v19, %v230_v21  ;;  %v284_v26 = vadd.f32 %v283_v24, %v282_v22 }
  0xe1   :  { %v3662_v28 = vpop.f32.mrb[4].mxu1 }
  0xe2   :  { %v286_v29 = vadd.f32 %v285_v20, %v284_v26  ;;  %v3664_v30 = vpop.f32.mrb[5].mxu1  ;;  %v234_v31 = vadd.f32 %v233_v27, %v232_v25  ;;  %v272_v39 = vmul.f32 %v3662_v28, %v3662_v28  ;;  %v239_v45 = vsel %vm227_vm1, %v3662_v28, 0.0 }
  0xe3   :  { %v235_v33 = vsel %vm227_vm1, %v3664_v30, 0.0  ;;  %v270_v34 = vmul.f32 %v3664_v30, %v3664_v30  ;;  %v3671_v35 = vpop.f32.mrb[6].mxu1 }
  0xe4   :  { %v236_v36 = vadd.f32 %v235_v33, %v234_v31  ;;  %v288_v37 = vadd.f32 %v287_v32, %v286_v29  ;;  %v3673_v38 = vpop.f32.mrb[7].mxu1  ;;  %v273_v46 = vmul.f32 %v3671_v35, %v3671_v35  ;;  %v293_v50 = vsel %vm227_vm1, %v272_v39, 0.0 }
  0xe5   :  { %v289_v40 = vsel %vm227_vm1, %v270_v34, 0.0  ;;  %v237_v41 = vsel %vm227_vm1, %v3673_v38, 0.0  ;;  %v271_v42 = vmul.f32 %v3673_v38, %v3673_v38  ;;  %v241_v51 = vsel %vm227_vm1, %v3671_v35, 0.0 }
  0xe6   :  { %v290_v43 = vadd.f32 %v289_v40, %v288_v37  ;;  %v238_v44 = vadd.f32 %v237_v41, %v236_v36  ;;  %v295_v56 = vsel %vm227_vm1, %v273_v46, 0.0 }
  0xe7   :  { %v291_v47 = vsel %vm227_vm1, %v271_v42, 0.0 }
  0xe8   :  { %v240_v48 = vadd.f32 %v239_v45, %v238_v44  ;;  %v292_v49 = vadd.f32 %v291_v47, %v290_v43 }
  0xe9   :  { %v3690_v52 = vpop.f32.mrb[8].mxu1 }
  0xea   :  { %v294_v53 = vadd.f32 %v293_v50, %v292_v49  ;;  %v3692_v54 = vpop.f32.mrb[9].mxu1  ;;  %v242_v55 = vadd.f32 %v241_v51, %v240_v48  ;;  %v276_v63 = vmul.f32 %v3690_v52, %v3690_v52  ;;  %v247_v5 = vsel %vm227_vm1, %v3690_v52, 0.0 }
  0xeb   :  { %v243_v57 = vsel %vm227_vm1, %v3692_v54, 0.0  ;;  %v274_v58 = vmul.f32 %v3692_v54, %v3692_v54  ;;  %v3699_v59 = vpop.f32.mrb[10].mxu1 }
  0xec   :  { %v244_v60 = vadd.f32 %v243_v57, %v242_v55  ;;  %v296_v61 = vadd.f32 %v295_v56, %v294_v53  ;;  %v3701_v62 = vpop.f32.mrb[11].mxu1  ;;  %v277_v6 = vmul.f32 %v3699_v59, %v3699_v59  ;;  %v301_v11 = vsel %vm227_vm1, %v276_v63, 0.0 }
  0xed   :  { %v297_v0 = vsel %vm227_vm1, %v274_v58, 0.0  ;;  %v245_v1 = vsel %vm227_vm1, %v3701_v62, 0.0  ;;  %v275_v2 = vmul.f32 %v3701_v62, %v3701_v62  ;;  %v249_v13 = vsel %vm227_vm1, %v3699_v59, 0.0 }
  0xee   :  { %v298_v3 = vadd.f32 %v297_v0, %v296_v61  ;;  %v246_v4 = vadd.f32 %v245_v1, %v244_v60  ;;  %v303_v20 = vsel %vm227_vm1, %v277_v6, 0.0 }
  0xef   :  { %v299_v7 = vsel %vm227_vm1, %v275_v2, 0.0 }
  0xf0   :  { %v248_v8 = vadd.f32 %v247_v5, %v246_v4  ;;  %v300_v9 = vadd.f32 %v299_v7, %v298_v3  ;;  %v330_v5 = vlaneseq  ;;  %v322_v7 = vld [vmem:[%s4292_s2] sm:$0x1] }
  0xf1   :  { %v3718_v16 = vpop.f32.mrb[12].mxu1 }
  0xf2   :  { %v302_v17 = vadd.f32 %v301_v11, %v300_v9  ;;  %v3720_v18 = vpop.f32.mrb[13].mxu1  ;;  %v250_v19 = vadd.f32 %v249_v13, %v248_v8  ;;  %v280_v27 = vmul.f32 %v3718_v16, %v3718_v16  ;;  %v255_v36 = vsel %vm227_vm1, %v3718_v16, 0.0  ;;  %v326_v13 = vld [vmem:[%s4293_s3] sm:$0x1] }
  0xf3   :  { %v251_v21 = vsel %vm227_vm1, %v3720_v18, 0.0  ;;  %v278_v22 = vmul.f32 %v3720_v18, %v3720_v18  ;;  %v3727_v23 = vpop.f32.mrb[14].mxu1  ;;  %v331_v6 = vshrl.u32 %v330_v5, 7 }
  0xf4   :  { %v252_v24 = vadd.f32 %v251_v21, %v250_v19  ;;  %v304_v25 = vadd.f32 %v303_v20, %v302_v17  ;;  %v215_v26 = vpop.f32.mrb[15].mxu1  ;;  %v281_v37 = vmul.f32 %v3727_v23, %v3727_v23  ;;  %v309_v42 = vsel %vm227_vm1, %v280_v27, 0.0 }
  0xf5   :  { %v305_v29 = vsel %vm227_vm1, %v278_v22, 0.0  ;;  %v253_v31 = vsel %vm227_vm1, %v215_v26, 0.0  ;;  %v279_v32 = vmul.f32 %v215_v26, %v215_v26  ;;  %v257_v43 = vsel %vm227_vm1, %v3727_v23, 0.0 }
  0xf6   :  { %v306_v33 = vadd.f32 %v305_v29, %v304_v25  ;;  %v254_v34 = vadd.f32 %v253_v31, %v252_v24  ;;  %v311_v46 = vsel %vm227_vm1, %v281_v37, 0.0  ;;  %v3745_v8 = vsub.s32 0, %v331_v6 }
  0xf7   :  { %v307_v39 = vsel %vm227_vm1, %v279_v32, 0.0 }
  0xf8   :  { %v256_v40 = vadd.f32 %v255_v36, %v254_v34  ;;  %v308_v41 = vadd.f32 %v307_v39, %v306_v33 }
  0xfa   :  { %v258_v44 = vadd.f32 %v257_v43, %v256_v40  ;;  %v310_v45 = vadd.f32 %v309_v42, %v308_v41 }
  0xfc   :  { %v259_v47 = vrot.slane %v258_v44, 4  ;;  %v312_v48 = vadd.f32 %v311_v46, %v310_v45 }
  0xfe   :  { %v260_v49 = vadd.f32 %v259_v47, %v258_v44  ;;  %v313_v50 = vrot.slane %v312_v48, 4 }
 0x100   :  { %v261_v51 = vrot.slane %v260_v49, 2  ;;  %v314_v53 = vadd.f32 %v313_v50, %v312_v48 }
 0x102   :  { %v262_v55 = vadd.f32 %v261_v51, %v260_v49  ;;  %v315_v56 = vrot.slane %v314_v53, 2 }
 0x104   :  { %v263_v57 = vrot.slane %v262_v55, 1  ;;  %v316_v58 = vadd.f32 %v315_v56, %v314_v53 }
 0x106   :  { %v264_v60 = vadd.f32 %v263_v57, %v262_v55  ;;  %v317_v61 = vrot.slane %v316_v58, 1 }
 0x108   :  { %v265_v63 = vmul.f32 0.0078125, %v264_v60  ;;  %v318_v0 = vadd.f32 %v317_v61, %v316_v58 }
 0x10a   :  { %v319_v1 = vmul.f32 0.0078125, %v318_v0  ;;  %v320_v2 = vmul.f32 %v265_v63, %v265_v63 }
 0x10c   :  { %v321_v3 = vsub.f32 %v319_v1, %v320_v2 }
 0x10e   :  { %v323_v4 = vadd.f32 1e-05, %v321_v3 }
 0x110   :  { %3530 = vrsqrt.f32 %v323_v4 }
 0x11a   :  { %v3531_v9 = vpop.eup %3530 }
 0x11b   :  { %v325_v11 = vmul.f32 %v3531_v9, %v322_v7 }
 0x11d   :  { %v327_v17 = vmul.f32 %v325_v11, %v265_v63  ;;  %v3751_v19 = vrot.slane %v325_v11, %v3745_v8 }
 0x11f   :  { %v328_v20 = vsub.f32 %v326_v13, %v327_v17  ;;  %v348_v21 = vmul.f32 %v3751_v19, %v215_v26  ;;  %v335_v22 = vmul.f32 %v3751_v19, %v3639_v12  ;;  %v336_v24 = vmul.f32 %v3751_v19, %v3645_v15 }
 0x120   :  { %v337_v25 = vmul.f32 %v3635_v10, %v3751_v19  ;;  %v338_v27 = vmul.f32 %v3643_v14, %v3751_v19  ;;  %v339_v29 = vmul.f32 %v3751_v19, %v3664_v30  ;;  %v340_v31 = vmul.f32 %v3751_v19, %v3673_v38 }
 0x121   :  { %v3767_v26 = vrot.slane %v328_v20, %v3745_v8  ;;  %v341_v12 = vmul.f32 %v3662_v28, %v3751_v19  ;;  %v342_v15 = vmul.f32 %v3671_v35, %v3751_v19  ;;  %v343_v10 = vmul.f32 %v3751_v19, %v3692_v54 }
 0x122   :  { %v344_v14 = vmul.f32 %v3751_v19, %v3701_v62  ;;  %v345_v30 = vmul.f32 %v3690_v52, %v3751_v19  ;;  %v346_v38 = vmul.f32 %v3699_v59, %v3751_v19  ;;  %v347_v32 = vmul.f32 %v3751_v19, %v3720_v18 }
 0x123   :  { %v3784_v28 = vadd.f32 %v3767_v26, %v348_v21  ;;  %v357_v35 = vadd.f32 %v3767_v26, %v335_v22  ;;  %v358_v33 = vadd.f32 %v3767_v26, %v336_v24  ;;  %v359_v54 = vadd.f32 %v3767_v26, %v337_v25 }
 0x124   :  { %v360_v62 = vadd.f32 %v3767_v26, %v338_v27  ;;  %v361_v34 = vadd.f32 %v3767_v26, %v339_v29  ;;  %v362_v52 = vadd.f32 %v3767_v26, %v340_v31  ;;  %v363_v59 = vadd.f32 %v3767_v26, %v341_v12 }
 0x125   :  { %vm373_vm2 = vcmp.gt.f32.partialorder %v357_v35, 0.0  ;;  %vm374_vm3 = vcmp.gt.f32.partialorder %v358_v33, 0.0  ;;  %v389_v18 = vmul.f32 0.2, %v357_v35  ;;  %v390_v36 = vmul.f32 0.2, %v358_v33 }
 0x126   :  { %vm375_vm4 = vcmp.gt.f32.partialorder %v359_v54, 0.0  ;;  %vm376_vm5 = vcmp.gt.f32.partialorder %v360_v62, 0.0  ;;  %v391_v37 = vmul.f32 0.2, %v359_v54  ;;  %v392_v39 = vmul.f32 0.2, %v360_v62 }
 0x127   :  { %v405_v40 = vsel %vm373_vm2, %v357_v35, %v389_v18  ;;  %v406_v41 = vsel %vm374_vm3, %v358_v33, %v390_v36  ;;  %vm377_vm6 = vcmp.gt.f32.partialorder %v361_v34, 0.0  ;;  %vm378_vm7 = vcmp.gt.f32.partialorder %v362_v52, 0.0  ;;  %v3440_v35 = vld [vmem:[%s4291_s4 + $0x30] sm:$0xff]   ;;  %v3441_v33 = vld [vmem:[%s4291_s4 + $0x38] sm:$0xff]   ;;  %v3447_v18 = vld [vmem:[%s4291_s4 + $0x68] sm:$0xff]  }
 0x128   :  { %v421_v42 = vpack.c.bf16 %v406_v41, %v405_v40  ;;  %v407_v43 = vsel %vm375_vm4, %v359_v54, %v391_v37  ;;  %v408_v44 = vsel %vm376_vm5, %v360_v62, %v392_v39  ;;  %v393_v45 = vmul.f32 0.2, %v361_v34  ;;  %v3442_v54 = vld [vmem:[%s4291_s4 + $0x40] sm:$0xff]   ;;  %v3443_v62 = vld [vmem:[%s4291_s4 + $0x48] sm:$0xff]   ;;  %v3448_v36 = vld [vmem:[%s4291_s4 + $0x70] sm:$0xff]  }
 0x129   :  { %v422_v46 = vpack.c.bf16 %v408_v44, %v407_v43  ;;  %v394_v47 = vmul.f32 0.2, %v362_v52  ;;  %v364_v48 = vadd.f32 %v3767_v26, %v342_v15  ;;  %vm379_vm8 = vcmp.gt.f32.partialorder %v363_v59, 0.0  ;;  %v3449_v37 = vld [vmem:[%s4291_s4 + $0x78] sm:$0xff]   ;;  %v3450_v39 = vld [vmem:[%s4291_s4 + $0x80] sm:$0xff]   ;;  %v3451_v40 = vld [vmem:[%s4291_s4 + $0x88] sm:$0xff]  }
 0x12a   :  { %3073 = vmatprep.subr.bf16.mxu1 %v421_v42  ;;  %v409_v49 = vsel %vm377_vm6, %v361_v34, %v393_v45  ;;  %v395_v50 = vmul.f32 0.2, %v363_v59  ;;  %v365_v51 = vadd.f32 %v3767_v26, %v343_v10  ;;  %v366_v53 = vadd.f32 %v3767_v26, %v344_v14  ;;  %v3444_v34 = vld [vmem:[%s4291_s4 + $0x50] sm:$0xff]   ;;  %v3454_v43 = vld [vmem:[%s4291_s4 + $0xa0] sm:$0xff]   ;;  %v3455_v44 = vld [vmem:[%s4291_s4 + $0xa8] sm:$0xff]  }
 0x12b   :  { %3074 = vmatpush3.bf16.msra.mxu1 %v421_v42  ;;  %v410_v55 = vsel %vm378_vm7, %v362_v52, %v394_v47  ;;  %vm380_vm9 = vcmp.gt.f32.partialorder %v364_v48, 0.0  ;;  %v396_v56 = vmul.f32 0.2, %v364_v48  ;;  %v367_v57 = vadd.f32 %v3767_v26, %v345_v30  ;;  %v3445_v52 = vld [vmem:[%s4291_s4 + $0x58] sm:$0xff]   ;;  %v3452_v41 = vld [vmem:[%s4291_s4 + $0x90] sm:$0xff]   ;;  %v3458_v47 = vld [vmem:[%s4291_s4 + $0xc0] sm:$0xff]  }
 0x12c   :  { %3075 = vmatprep.subr.bf16.mxu1 %v422_v46  ;;  %v423_v58 = vpack.c.bf16 %v410_v55, %v409_v49  ;;  %v411_v60 = vsel %vm379_vm8, %v363_v59, %v395_v50  ;;  %vm381_vm10 = vcmp.gt.f32.partialorder %v365_v51, 0.0  ;;  %vm382_vm11 = vcmp.gt.f32.partialorder %v366_v53, 0.0  ;;  %v3446_v59 = vld [vmem:[%s4291_s4 + $0x60] sm:$0xff]   ;;  %v3453_v42 = vld [vmem:[%s4291_s4 + $0x98] sm:$0xff]   ;;  %v3456_v45 = vld [vmem:[%s4291_s4 + $0xb0] sm:$0xff]  }
 0x12d   :  { %v412_v61 = vsel %vm380_vm9, %v364_v48, %v396_v56  ;;  %v397_v63 = vmul.f32 0.2, %v365_v51  ;;  %v398_v0 = vmul.f32 0.2, %v366_v53  ;;  %v368_v1 = vadd.f32 %v3767_v26, %v346_v38  ;;  %v3437_v38 = vld [vmem:[%s4291_s4 + $0x18] sm:$0xff]   ;;  %v3467_v48 = vld [vmem:[%s4294_s5 + $0x28] sm:$0xff]  }
 0x12e   :  { %v424_v2 = vpack.c.bf16 %v412_v61, %v411_v60  ;;  %vm383_vm12 = vcmp.gt.f32.partialorder %v367_v57, 0.0  ;;  %v399_v3 = vmul.f32 0.2, %v367_v57  ;;  %v369_v4 = vadd.f32 %v3767_v26, %v347_v32  ;;  %v3438_v32 = vld [vmem:[%s4291_s4 + $0x20] sm:$0xff]   ;;  %v3468_v49 = vld [vmem:[%s4294_s5 + $0x30] sm:$0xff]   ;;  %v3459_v50 = vld [vmem:[%s4291_s4 + $0xc8] sm:$0xff]  }
 0x12f   :  { %3076 = vmatpush3.bf16.msra.mxu1 %v422_v46  ;;  %v413_v5 = vsel %vm381_vm10, %v365_v51, %v397_v63  ;;  %v414_v6 = vsel %vm382_vm11, %v366_v53, %v398_v0  ;;  %vm384_vm13 = vcmp.gt.f32.partialorder %v368_v1, 0.0  ;;  %v400_v7 = vmul.f32 0.2, %v368_v1  ;;  %v3457_v46 = vld [vmem:[%s4291_s4 + $0xb8] sm:$0xff]   ;;  %v3460_v51 = vld [vmem:[%s4291_s4 + $0xd0] sm:$0xff]   ;;  %v3470_v55 = vld [vmem:[%s4294_s5] sm:$0xff]  }
 0x130   :  { %3077 = vmatprep.subr.bf16.mxu1 %v423_v58  ;;  %v425_v9 = vpack.c.bf16 %v414_v6, %v413_v5  ;;  %v415_v11 = vsel %vm383_vm12, %v367_v57, %v399_v3  ;;  %vm385_vm14 = vcmp.gt.f32.partialorder %v369_v4, 0.0  ;;  %vm386_vm15 = vcmp.gt.f32.partialorder %v3784_v28, 0.0  ;;  %v3469_v53 = vld [vmem:[%s4294_s5 + $0x38] sm:$0xff]   ;;  %v3471_v56 = vld [vmem:[%s4294_s5 + $0x60] sm:$0xff]   ;;  %v3473_v60 = vld [vmem:[%s4294_s5 + $0x68] sm:$0xff]  }
 0x131   :  { %v416_v13 = vsel %vm384_vm13, %v368_v1, %v400_v7  ;;  %v401_v17 = vmul.f32 0.2, %v369_v4  ;;  %v402_v20 = vmul.f32 0.2, %v3784_v28  ;;  %v349_v21 = vmul.f32 %v3718_v16, %v3751_v19  ;;  %3189 = vmatprep.subr.bf16.mxu0 %v3471_v56  ;;  %v3461_v57 = vld [vmem:[%s4291_s4 + $0xd8] sm:$0xff]   ;;  %v3475_v61 = vld [vmem:[%s4294_s5 + $0x70] sm:$0xff]  }
 0x132   :  { %v426_v22 = vpack.c.bf16 %v416_v13, %v415_v11  ;;  %v350_v24 = vmul.f32 %v3727_v23, %v3751_v19  ;;  %v3464_v23 = vld [vmem:[%s4294_s5 + $0x20] sm:$0xff]   ;;  %v3435_v19 = vld [vmem:[%s4291_s4 + $0x8] sm:$0xff]   ;;  %3190 = vmatpush3.bf16.msra.mxu0 %v3471_v56  ;;  %v3465_v0 = vld [vmem:[%s4291_s4 + $0xf0] sm:$0xff]   ;;  %vm3535_vm6 = vmmov 0   ;;  %vm2558_vm7 = vcmask 261120  }
 0x133   :  { %3078 = vmatpush3.bf16.msra.mxu1 %v423_v58  ;;  %v417_v25 = vsel %vm385_vm14, %v369_v4, %v401_v17  ;;  %v418_v27 = vsel %vm386_vm15, %v3784_v28, %v402_v20  ;;  %v371_v29 = vadd.f32 %v3767_v26, %v349_v21  ;;  %v3439_v28 = vld [vmem:[%s4291_s4 + $0x28] sm:$0xff]   ;;  %v3462_v58 = vld [vmem:[%s4291_s4 + $0xe0] sm:$0xff]   ;;  %3191 = vmatprep.subr.bf16.mxu0 %v3473_v60  ;;  %v3477_v1 = vld [vmem:[%s4294_s5 + $0x78] sm:$0xff]   ;;  %vm2632_vm8 = vcmask 1024  }
 0x134   :  { %3079 = vmatprep.subr.bf16.mxu1 %v424_v2  ;;  %v427_v31 = vpack.c.bf16 %v418_v27, %v417_v25  ;;  %v372_v12 = vadd.f32 %v3767_v26, %v350_v24  ;;  %v3436_v26 = vld [vmem:[%s4291_s4 + $0x10] sm:$0xff]   ;;  %v3463_v63 = vld [vmem:[%s4291_s4 + $0xe8] sm:$0xff]   ;;  %v3466_v3 = vld [vmem:[%s4291_s4 + $0xf8] sm:$0xff]  }
 0x135   :  { %vm387_vm0 = vcmp.gt.f32.partialorder %v371_v29, 0.0  ;;  %v403_v15 = vmul.f32 0.2, %v371_v29  ;;  %v3472_v25 = vld [vmem:[%s4294_s5 + $0x8] sm:$0xff]  }
 0x136   :  { %vm388_vm2 = vcmp.gt.f32.partialorder %v372_v12, 0.0  ;;  %v404_v10 = vmul.f32 0.2, %v372_v12  ;;  %3192 = vmatpush3.bf16.msra.mxu0 %v3473_v60 }
 0x137   :  { %3080 = vmatpush3.bf16.msra.mxu1 %v424_v2  ;;  %v419_v16 = vsel %vm387_vm0, %v371_v29, %v403_v15  ;;  %3193 = vmatprep.subr.bf16.mxu0 %v3475_v61  ;;  %v3479_v2 = vld [vmem:[%s4294_s5 + $0x80] sm:$0xff]  }
 0x138   :  { %3081 = vmatprep.subr.bf16.mxu1 %v425_v9  ;;  %v420_v14 = vsel %vm388_vm2, %v372_v12, %v404_v10 }
 0x139   :  { %v428_v30 = vpack.c.bf16 %v420_v14, %v419_v16  ;;  %v3476_v14 = vld [vmem:[%s4294_s5 + $0x18] sm:$0xff]  }
 0x13a   :  { %3194 = vmatpush3.bf16.msra.mxu0 %v3475_v61 }
 0x13b   :  { %3082 = vmatpush3.bf16.msra.mxu1 %v425_v9  ;;  %3195 = vmatprep.subr.bf16.mxu0 %v3477_v1 }
 0x13c   :  { %3083 = vmatprep.subr.bf16.mxu1 %v426_v22 }
 0x13e   :  { %3196 = vmatpush3.bf16.msra.mxu0 %v3477_v1 }
 0x13f   :  { %3084 = vmatpush3.bf16.msra.mxu1 %v426_v22  ;;  %3201 = vmatprep.subr.bf16.mxu0 %v3479_v2 }
 0x140   :  { %3085 = vmatprep.subr.bf16.mxu1 %v427_v31 }
 0x143   :  { %3086 = vmatpush3.bf16.msra.mxu1 %v427_v31  ;;  %v3474_v31 = vld [vmem:[%s4294_s5 + $0x10] sm:$0xff]  }
 0x144   :  { %3087 = vmatprep.subr.bf16.mxu1 %v428_v30 }
 0x147   :  { %3088 = vmatpush3.bf16.msra.mxu1 %v428_v30 }
 0x148   :  { %3153 = vmatprep.subr.bf16.mxu1 %v3464_v23 }
 0x14a   :  { %3090 = vmatmul.mubr.bf16.vlgmr.msra.gmra.mrb[16].mxu1 %v3435_v19  ;;  %v3478_v19 = vld [vmem:[%s4294_s5 + $0x40] sm:$0xff]  }
 0x14b   :  { %3093 = vmatprep.mubr.bf16.mxu1 %v3436_v26  ;;  %3154 = vmatpush3.bf16.msra.mxu1 %v3464_v23 }
 0x14c   :  { %3155 = vmatprep.subr.bf16.mxu1 %v3467_v48 }
 0x14f   :  { %3156 = vmatpush3.bf16.msra.mxu1 %v3467_v48  ;;  %v3487_v48 = vld [vmem:[%s4294_s5 + $0xa8] sm:$0xff]  }
 0x150   :  { %3157 = vmatprep.subr.bf16.mxu1 %v3468_v49 }
 0x152   :  { %3094 = vmatmul.mubr.bf16.gmra.mrb[20].mxu1 %v3437_v38 }
 0x153   :  { %3097 = vmatprep.mubr.bf16.mxu1 %v3438_v32  ;;  %3158 = vmatpush3.bf16.msra.mxu1 %v3468_v49 }
 0x154   :  { %3159 = vmatprep.subr.bf16.mxu1 %v3469_v53 }
 0x157   :  { %3160 = vmatpush3.bf16.msra.mxu1 %v3469_v53 }
 0x158   :  { %3165 = vmatprep.subr.bf16.mxu1 %v3470_v55 }
 0x15a   :  { %3098 = vmatmul.mubr.bf16.gmra.mrb[24].mxu1 %v3439_v28 }
 0x15b   :  { %3101 = vmatprep.mubr.bf16.mxu1 %v3440_v35  ;;  %v3480_v35 = vld [vmem:[%s4294_s5 + $0x48] sm:$0xff]  }
 0x162   :  { %3102 = vmatmul.mubr.bf16.gmra.mrb[28].mxu1 %v3441_v33  ;;  %v3481_v33 = vld [vmem:[%s4294_s5 + $0x88] sm:$0xff]  }
 0x163   :  { %3105 = vmatprep.mubr.bf16.mxu1 %v3442_v54 }
 0x16a   :  { %3106 = vmatmul.mubr.bf16.gmra.mrb[32].mxu1 %v3443_v62 }
 0x16b   :  { %3109 = vmatprep.mubr.bf16.mxu1 %v3444_v34  ;;  %v3482_v34 = vld [vmem:[%s4294_s5 + $0x50] sm:$0xff]  }
 0x172   :  { %3110 = vmatmul.mubr.bf16.gmra.mrb[36].mxu1 %v3445_v52  ;;  %v3483_v52 = vld [vmem:[%s4294_s5 + $0x90] sm:$0xff]  }
 0x173   :  { %3113 = vmatprep.mubr.bf16.mxu1 %v3446_v59 }
 0x17a   :  { %3114 = vmatmul.mubr.bf16.gmra.mrb[40].mxu1 %v3447_v18 }
 0x17b   :  { %3117 = vmatprep.mubr.bf16.mxu1 %v3448_v36 }
 0x182   :  { %3118 = vmatmul.mubr.bf16.gmra.mrb[44].mxu1 %v3449_v37 }
 0x183   :  { %3121 = vmatprep.mubr.bf16.mxu1 %v3450_v39  ;;  %v3484_v39 = vld [vmem:[%s4294_s5 + $0x58] sm:$0xff]  }
 0x18a   :  { %3122 = vmatmul.mubr.bf16.gmra.mrb[48].mxu1 %v3451_v40  ;;  %v3485_v40 = vld [vmem:[%s4294_s5 + $0x98] sm:$0xff]  }
 0x18b   :  { %3125 = vmatprep.mubr.bf16.mxu1 %v3452_v41 }
 0x192   :  { %3126 = vmatmul.mubr.bf16.gmra.mrb[52].mxu1 %v3453_v42 }
 0x193   :  { %3129 = vmatprep.mubr.bf16.mxu1 %v3454_v43  ;;  %v3486_v43 = vld [vmem:[%s4294_s5 + $0xa0] sm:$0xff]  }
 0x19a   :  { %3130 = vmatmul.mubr.bf16.gmra.mrb[56].mxu1 %v3455_v44 }
 0x19b   :  { %3133 = vmatprep.mubr.bf16.mxu1 %v3456_v45 }
 0x1a2   :  { %3134 = vmatmul.mubr.bf16.gmra.mrb[60].mxu1 %v3457_v46 }
 0x1a3   :  { %3137 = vmatprep.mubr.bf16.mxu1 %v3458_v47 }
 0x1aa   :  { %3138 = vmatmul.mubr.bf16.gmra.mrb[64].mxu1 %v3459_v50 }
 0x1ab   :  { %3141 = vmatprep.mubr.bf16.mxu1 %v3460_v51  ;;  %v3488_v51 = vld [vmem:[%s4294_s5 + $0xb0] sm:$0xff]  }
 0x1b2   :  { %3142 = vmatmul.mubr.bf16.gmra.mrb[68].mxu1 %v3461_v57 }
 0x1b3   :  { %3145 = vmatprep.mubr.bf16.mxu1 %v3462_v58  ;;  %v3489_v58 = vld [vmem:[%s4294_s5 + $0xb8] sm:$0xff]  }
 0x1ba   :  { %3146 = vmatmul.mubr.bf16.gmra.mrb[72].mxu1 %v3463_v63  ;;  %v3490_v63 = vld [vmem:[%s4294_s5 + $0xc0] sm:$0xff]  }
 0x1bb   :  { %3149 = vmatprep.mubr.bf16.mxu1 %v3465_v0 }
 0x1c2   :  { %3150 = vmatmul.mubr.bf16.gmra.mrb[76].mxu1 %v3466_v3 }
 0x21d   :  { %v3091_v4 = vpop.f32.mrb[16].mxu1 }
 0x21e   :  { %v719_v5 = vpop.f32.mrb[17].mxu1 }
 0x21f   :  { %v3092_v6 = vpop.f32.mrb[18].mxu1 }
 0x220   :  { %v975_v7 = vpack.c.bf16 %v3092_v6, %v3091_v4  ;;  %v722_v9 = vpop.f32.mrb[19].mxu1  ;;  %v3491_v4 = vld [vmem:[%s4294_s5 + $0xc8] sm:$0xff]  }
 0x221   :  { %v974_v11 = vpack.c.bf16 %v722_v9, %v719_v5 }
 0x225   :  { %v3095_v13 = vpop.f32.mrb[20].mxu1 }
 0x226   :  { %v735_v17 = vpop.f32.mrb[21].mxu1 }
 0x227   :  { %v3096_v20 = vpop.f32.mrb[22].mxu1 }
 0x228   :  { %v977_v21 = vpack.c.bf16 %v3096_v20, %v3095_v13  ;;  %v738_v22 = vpop.f32.mrb[23].mxu1  ;;  %v3493_v20 = vld [vmem:[%s4294_s5 + $0xd8] sm:$0xff]  }
 0x229   :  { %v976_v24 = vpack.c.bf16 %v738_v22, %v735_v17 }
 0x22b   :  { %3161 = vmatprep.mubr.msk.bf16.mxu1 %vm227_vm1, %v976_v24  ;;  %v3494_v24 = vld [vmem:[%s4294_s5 + $0xe0] sm:$0xff]  }
 0x22c   :  { %3162 = vmatmul.mubr.msk.bf16.vlgmr.msra.gmra.mrb[80].mxu1 %vm227_vm1, %v977_v21 }
 0x22d   :  { %3166 = vmatpush3.bf16.msra.mxu1 %v3470_v55  ;;  %v3936_v27 = vpop.f32.mrb[24].mxu1  ;;  %3173 = vmatprep.mubr.msk.bf16.mxu1 %vm227_vm1, %v974_v11 }
 0x22e   :  { %v751_v29 = vpop.f32.mrb[25].mxu1  ;;  %3167 = vmatprep.subr.bf16.mxu1 %v3472_v25 }
 0x22f   :  { %v3100_v12 = vpop.f32.mrb[26].mxu1 }
 0x230   :  { %v979_v15 = vpack.c.bf16 %v3100_v12, %v3936_v27  ;;  %v754_v10 = vpop.f32.mrb[27].mxu1  ;;  %v3495_v12 = vld [vmem:[%s4294_s5 + $0xe8] sm:$0xff]  }
 0x231   :  { %v978_v16 = vpack.c.bf16 %v754_v10, %v751_v29  ;;  %3168 = vmatpush3.bf16.msra.mxu1 %v3472_v25 }
 0x232   :  { %3169 = vmatprep.subr.bf16.mxu1 %v3474_v31 }
 0x235   :  { %3170 = vmatpush3.bf16.msra.mxu1 %v3474_v31  ;;  %v3103_v30 = vpop.f32.mrb[28].mxu1 }
 0x236   :  { %v767_v23 = vpop.f32.mrb[29].mxu1  ;;  %3171 = vmatprep.subr.bf16.mxu1 %v3476_v14 }
 0x237   :  { %v3104_v26 = vpop.f32.mrb[30].mxu1 }
 0x238   :  { %v981_v38 = vpack.c.bf16 %v3104_v26, %v3103_v30  ;;  %v770_v32 = vpop.f32.mrb[31].mxu1  ;;  %v3497_v26 = vld [vmem:[%s4294_s5 + $0xf8] sm:$0xff]  }
 0x239   :  { %v980_v28 = vpack.c.bf16 %v770_v32, %v767_v23  ;;  %3172 = vmatpush3.bf16.msra.mxu1 %v3476_v14 }
 0x23a   :  { %3177 = vmatprep.subr.bf16.mxu1 %v3478_v19 }
 0x23b   :  { %3197 = vmatprep.mubr.msk.bf16.mxu0 %vm227_vm1, %v980_v28  ;;  %v3498_v28 = vld [vmem:[%s4294_s5 + $0x100] sm:$0xff]  }
 0x23c   :  { %3174 = vmatmul.mubr.msk.bf16.vlgmr.msra.gmra.mrb[80].mxu1 %vm227_vm1, %v975_v7  ;;  %3198 = vmatmul.mubr.msk.bf16.vlgmr.msra.gmra.mrb[0].mxu0 %vm227_vm1, %v981_v38  ;;  %v3492_v7 = vld [vmem:[%s4294_s5 + $0xd0] sm:$0xff]  }
 0x23d   :  { %3178 = vmatpush3.bf16.msra.mxu1 %v3478_v19  ;;  %3185 = vmatprep.mubr.msk.bf16.mxu1 %vm227_vm1, %v978_v16  ;;  %v3107_v54 = vpop.f32.mrb[32].mxu1  ;;  %v3496_v16 = vld [vmem:[%s4294_s5 + $0xf0] sm:$0xff]  }
 0x23e   :  { %3202 = vmatpush3.bf16.msra.mxu0 %v3479_v2  ;;  %3179 = vmatprep.subr.bf16.mxu1 %v3480_v35  ;;  %v783_v62 = vpop.f32.mrb[33].mxu1 }
 0x23f   :  { %3203 = vmatprep.subr.bf16.mxu0 %v3481_v33  ;;  %v3108_v59 = vpop.f32.mrb[34].mxu1 }
 0x240   :  { %v983_v18 = vpack.c.bf16 %v3108_v59, %v3107_v54  ;;  %v786_v36 = vpop.f32.mrb[35].mxu1 }
 0x241   :  { %3180 = vmatpush3.bf16.msra.mxu1 %v3480_v35  ;;  %v982_v37 = vpack.c.bf16 %v786_v36, %v783_v62 }
 0x242   :  { %3204 = vmatpush3.bf16.msra.mxu0 %v3481_v33  ;;  %3181 = vmatprep.subr.bf16.mxu1 %v3482_v34 }
 0x243   :  { %3205 = vmatprep.subr.bf16.mxu0 %v3483_v52  ;;  %3209 = vmatprep.mubr.msk.bf16.mxu0 %vm227_vm1, %v982_v37 }
 0x245   :  { %3182 = vmatpush3.bf16.msra.mxu1 %v3482_v34  ;;  %v3111_v41 = vpop.f32.mrb[36].mxu1  ;;  %v3499_v34 = vld [vmem:[%s4294_s5 + $0x108] sm:$0xff]  }
 0x246   :  { %3206 = vmatpush3.bf16.msra.mxu0 %v3483_v52  ;;  %3183 = vmatprep.subr.bf16.mxu1 %v3484_v39  ;;  %v799_v42 = vpop.f32.mrb[37].mxu1 }
 0x247   :  { %3207 = vmatprep.subr.bf16.mxu0 %v3485_v40  ;;  %v3112_v44 = vpop.f32.mrb[38].mxu1 }
 0x248   :  { %v985_v45 = vpack.c.bf16 %v3112_v44, %v3111_v41  ;;  %v802_v46 = vpop.f32.mrb[39].mxu1  ;;  %v3501_v41 = vld [vmem:[%s4294_s5 + $0x118] sm:$0xff]   ;;  %v3502_v44 = vld [vmem:[%s4294_s5 + $0x120] sm:$0xff]  }
 0x249   :  { %3184 = vmatpush3.bf16.msra.mxu1 %v3484_v39  ;;  %v984_v47 = vpack.c.bf16 %v802_v46, %v799_v42 }
 0x24a   :  { %3208 = vmatpush3.bf16.msra.mxu0 %v3485_v40 }
 0x24b   :  { %3213 = vmatprep.subr.bf16.mxu0 %v3486_v43 }
 0x24c   :  { %3186 = vmatmul.mubr.msk.bf16.vlgmr.msra.gmra.mrb[80].mxu1 %vm227_vm1, %v979_v15 }
 0x24d   :  { %3210 = vmatmul.mubr.msk.bf16.vlgmr.msra.gmra.mrb[0].mxu0 %vm227_vm1, %v983_v18  ;;  %v3115_v49 = vpop.f32.mrb[40].mxu1  ;;  %v3500_v18 = vld [vmem:[%s4294_s5 + $0x110] sm:$0xff]  }
 0x24e   :  { %3214 = vmatpush3.bf16.msra.mxu0 %v3486_v43  ;;  %3221 = vmatprep.mubr.msk.bf16.mxu0 %vm227_vm1, %v984_v47  ;;  %v815_v50 = vpop.f32.mrb[41].mxu1 }
 0x24f   :  { %3215 = vmatprep.subr.bf16.mxu0 %v3487_v48  ;;  %v3116_v53 = vpop.f32.mrb[42].mxu1 }
 0x250   :  { %v987_v55 = vpack.c.bf16 %v3116_v53, %v3115_v49  ;;  %v818_v56 = vpop.f32.mrb[43].mxu1  ;;  %v3503_v49 = vld [vmem:[%s4294_s5 + $0x128] sm:$0xff]   ;;  %v3504_v53 = vld [vmem:[%s4294_s5 + $0x130] sm:$0xff]  }
 0x251   :  { %v986_v57 = vpack.c.bf16 %v818_v56, %v815_v50 }
 0x252   :  { %3216 = vmatpush3.bf16.msra.mxu0 %v3487_v48 }
 0x253   :  { %3217 = vmatprep.subr.bf16.mxu0 %v3488_v51 }
 0x255   :  { %v3987_v60 = vpop.f32.mrb[44].mxu1 }
 0x256   :  { %3218 = vmatpush3.bf16.msra.mxu0 %v3488_v51  ;;  %v831_v61 = vpop.f32.mrb[45].mxu1 }
 0x257   :  { %3219 = vmatprep.subr.bf16.mxu0 %v3489_v58  ;;  %v3120_v0 = vpop.f32.mrb[46].mxu1 }
 0x258   :  { %v989_v1 = vpack.c.bf16 %v3120_v0, %v3987_v60  ;;  %v834_v2 = vpop.f32.mrb[47].mxu1  ;;  %v3505_v60 = vld [vmem:[%s4294_s5 + $0x138] sm:$0xff]   ;;  %v3506_v0 = vld [vmem:[%s4294_s5 + $0x140] sm:$0xff]  }
 0x259   :  { %v988_v3 = vpack.c.bf16 %v834_v2, %v831_v61 }
 0x25a   :  { %3220 = vmatpush3.bf16.msra.mxu0 %v3489_v58 }
 0x25b   :  { %3225 = vmatprep.subr.bf16.mxu0 %v3490_v63 }
 0x25d   :  { %3222 = vmatmul.mubr.msk.bf16.vlgmr.msra.gmra.mrb[0].mxu0 %vm227_vm1, %v985_v45  ;;  %v3997_v5 = vpop.f32.mrb[48].mxu1 }
 0x25e   :  { %3226 = vmatpush3.bf16.msra.mxu0 %v3490_v63  ;;  %3233 = vmatprep.mubr.msk.bf16.mxu0 %vm227_vm1, %v986_v57  ;;  %v847_v6 = vpop.f32.mrb[49].mxu1 }
 0x25f   :  { %3227 = vmatprep.subr.bf16.mxu0 %v3491_v4  ;;  %v4003_v9 = vpop.f32.mrb[50].mxu1 }
 0x260   :  { %v991_v11 = vpack.c.bf16 %v4003_v9, %v3997_v5  ;;  %v850_v13 = vpop.f32.mrb[51].mxu1  ;;  %v3507_v5 = vld [vmem:[%s4294_s5 + $0x148] sm:$0xff]   ;;  %v3510_v9 = vld [vmem:[%s4294_s5 + $0x160] sm:$0xff]  }
 0x261   :  { %v990_v17 = vpack.c.bf16 %v850_v13, %v847_v6  ;;  %v3508_v6 = vld [vmem:[%s4294_s5 + $0x150] sm:$0xff]  }
 0x262   :  { %3228 = vmatpush3.bf16.msra.mxu0 %v3491_v4  ;;  %v3512_v13 = vld [vmem:[%s4294_s5 + $0x170] sm:$0xff]  }
 0x263   :  { %3229 = vmatprep.subr.bf16.mxu0 %v3492_v7 }
 0x265   :  { %v4010_v21 = vpop.f32.mrb[52].mxu1 }
 0x266   :  { %3230 = vmatpush3.bf16.msra.mxu0 %v3492_v7  ;;  %v4012_v22 = vpop.f32.mrb[53].mxu1  ;;  %v3509_v7 = vld [vmem:[%s4294_s5 + $0x158] sm:$0xff]  }
 0x267   :  { %3231 = vmatprep.subr.bf16.mxu0 %v3493_v20  ;;  %v4017_v25 = vpop.f32.mrb[54].mxu1 }
 0x268   :  { %v993_v27 = vpack.c.bf16 %v4017_v25, %v4010_v21  ;;  %v866_v29 = vpop.f32.mrb[55].mxu1  ;;  %v3515_v21 = vld [vmem:[%s4294_s5 + $0x188] sm:$0xff]   ;;  %v3518_v25 = vld [vmem:[%s4294_s5 + $0x1a0] sm:$0xff]  }
 0x269   :  { %v992_v31 = vpack.c.bf16 %v866_v29, %v4012_v22  ;;  %v3516_v22 = vld [vmem:[%s4294_s5 + $0x190] sm:$0xff]  }
 0x26a   :  { %3232 = vmatpush3.bf16.msra.mxu0 %v3493_v20  ;;  %v3514_v20 = vld [vmem:[%s4294_s5 + $0x180] sm:$0xff]   ;;  %v3520_v29 = vld [vmem:[%s4294_s5 + $0x1b0] sm:$0xff]  }
 0x26b   :  { %3237 = vmatprep.subr.bf16.mxu0 %v3494_v24 }
 0x26d   :  { %3234 = vmatmul.mubr.msk.bf16.vlgmr.msra.gmra.mrb[0].mxu0 %vm227_vm1, %v987_v55  ;;  %v4026_v15 = vpop.f32.mrb[56].mxu1 }
 0x26e   :  { %3238 = vmatpush3.bf16.msra.mxu0 %v3494_v24  ;;  %3245 = vmatprep.mubr.msk.bf16.mxu0 %vm227_vm1, %v988_v3  ;;  %v4029_v10 = vpop.f32.mrb[57].mxu1  ;;  %v3517_v24 = vld [vmem:[%s4294_s5 + $0x198] sm:$0xff]  }
 0x26f   :  { %3239 = vmatprep.subr.bf16.mxu0 %v3495_v12  ;;  %v4034_v14 = vpop.f32.mrb[58].mxu1 }
 0x270   :  { %v995_v30 = vpack.c.bf16 %v4034_v14, %v4026_v15  ;;  %v4038_v23 = vpop.f32.mrb[59].mxu1  ;;  %v3523_v15 = vld [vmem:[%s4294_s5 + $0x1c8] sm:$0xff]   ;;  %v3526_v14 = vld [vmem:[%s4294_s5 + $0x1e0] sm:$0xff]  }
 0x271   :  { %v994_v19 = vpack.c.bf16 %v4038_v23, %v4029_v10  ;;  %v3524_v10 = vld [vmem:[%s4294_s5 + $0x1d0] sm:$0xff]  }
 0x272   :  { %3240 = vmatpush3.bf16.msra.mxu0 %v3495_v12  ;;  %v3522_v12 = vld [vmem:[%s4294_s5 + $0x1c0] sm:$0xff]   ;;  %v3528_v23 = vld [vmem:[%s4294_s5 + $0x1f0] sm:$0xff]  }
 0x273   :  { %3241 = vmatprep.subr.bf16.mxu0 %v3496_v16 }
 0x275   :  { %v4045_v38 = vpop.f32.mrb[60].mxu1 }
 0x276   :  { %3242 = vmatpush3.bf16.msra.mxu0 %v3496_v16  ;;  %v4047_v32 = vpop.f32.mrb[61].mxu1  ;;  %v3525_v16 = vld [vmem:[%s4294_s5 + $0x1d8] sm:$0xff]  }
 0x277   :  { %3243 = vmatprep.subr.bf16.mxu0 %v3497_v26  ;;  %v4052_v35 = vpop.f32.mrb[62].mxu1 }
 0x278   :  { %v997_v33 = vpack.c.bf16 %v4052_v35, %v4045_v38  ;;  %v4056_v54 = vpop.f32.mrb[63].mxu1 }
 0x279   :  { %v996_v62 = vpack.c.bf16 %v4056_v54, %v4047_v32 }
 0x27a   :  { %3244 = vmatpush3.bf16.msra.mxu0 %v3497_v26 }
 0x27b   :  { %3249 = vmatprep.subr.bf16.mxu0 %v3498_v28 }
 0x27d   :  { %3246 = vmatmul.mubr.msk.bf16.vlgmr.msra.gmra.mrb[0].mxu0 %vm227_vm1, %v989_v1  ;;  %v4064_v52 = vpop.f32.mrb[64].mxu1 }
 0x27e   :  { %3250 = vmatpush3.bf16.msra.mxu0 %v3498_v28  ;;  %3257 = vmatprep.mubr.msk.bf16.mxu0 %vm227_vm1, %v990_v17  ;;  %v4067_v59 = vpop.f32.mrb[65].mxu1  ;;  %v3513_v17 = vld [vmem:[%s4294_s5 + $0x178] sm:$0xff]  }
 0x27f   :  { %3251 = vmatprep.subr.bf16.mxu0 %v3499_v34  ;;  %v4072_v36 = vpop.f32.mrb[66].mxu1 }
 0x280   :  { %v999_v37 = vpack.c.bf16 %v4072_v36, %v4064_v52  ;;  %v4076_v39 = vpop.f32.mrb[67].mxu1 }
 0x281   :  { %v998_v40 = vpack.c.bf16 %v4076_v39, %v4067_v59 }
 0x282   :  { %3252 = vmatpush3.bf16.msra.mxu0 %v3499_v34 }
 0x283   :  { %3253 = vmatprep.subr.bf16.mxu0 %v3500_v18 }
 0x285   :  { %v4083_v42 = vpop.f32.mrb[68].mxu1 }
 0x286   :  { %3254 = vmatpush3.bf16.msra.mxu0 %v3500_v18  ;;  %v4085_v43 = vpop.f32.mrb[69].mxu1 }
 0x287   :  { %3255 = vmatprep.subr.bf16.mxu0 %v3501_v41  ;;  %v4090_v45 = vpop.f32.mrb[70].mxu1 }
 0x288   :  { %v1001_v46 = vpack.c.bf16 %v4090_v45, %v4083_v42  ;;  %v4094_v47 = vpop.f32.mrb[71].mxu1 }
 0x289   :  { %v1000_v48 = vpack.c.bf16 %v4094_v47, %v4085_v43 }
 0x28a   :  { %3256 = vmatpush3.bf16.msra.mxu0 %v3501_v41 }
 0x28b   :  { %3261 = vmatprep.subr.bf16.mxu0 %v3502_v44 }
 0x28d   :  { %3258 = vmatmul.mubr.msk.bf16.vlgmr.msra.gmra.mrb[0].mxu0 %vm227_vm1, %v991_v11  ;;  %v4105_v50 = vpop.f32.mrb[72].mxu1  ;;  %v3511_v11 = vld [vmem:[%s4294_s5 + $0x168] sm:$0xff]  }
 0x28e   :  { %3262 = vmatpush3.bf16.msra.mxu0 %v3502_v44  ;;  %3269 = vmatprep.mubr.msk.bf16.mxu0 %vm227_vm1, %v992_v31  ;;  %v4108_v51 = vpop.f32.mrb[73].mxu1  ;;  %v3521_v31 = vld [vmem:[%s4294_s5 + $0x1b8] sm:$0xff]  }
 0x28f   :  { %3263 = vmatprep.subr.bf16.mxu0 %v3503_v49  ;;  %v4113_v55 = vpop.f32.mrb[74].mxu1 }
 0x290   :  { %v1003_v56 = vpack.c.bf16 %v4113_v55, %v4105_v50  ;;  %v4117_v57 = vpop.f32.mrb[75].mxu1 }
 0x291   :  { %v1002_v58 = vpack.c.bf16 %v4117_v57, %v4108_v51 }
 0x292   :  { %3264 = vmatpush3.bf16.msra.mxu0 %v3503_v49 }
 0x293   :  { %3265 = vmatprep.subr.bf16.mxu0 %v3504_v53 }
 0x295   :  { %v4124_v61 = vpop.f32.mrb[76].mxu1 }
 0x296   :  { %3266 = vmatpush3.bf16.msra.mxu0 %v3504_v53  ;;  %v4126_v63 = vpop.f32.mrb[77].mxu1 }
 0x297   :  { %3267 = vmatprep.subr.bf16.mxu0 %v3505_v60  ;;  %v4131_v1 = vpop.f32.mrb[78].mxu1 }
 0x298   :  { %v1005_v2 = vpack.c.bf16 %v4131_v1, %v4124_v61  ;;  %v4135_v3 = vpop.f32.mrb[79].mxu1 }
 0x299   :  { %v1004_v4 = vpack.c.bf16 %v4135_v3, %v4126_v63 }
 0x29a   :  { %3268 = vmatpush3.bf16.msra.mxu0 %v3505_v60 }
 0x29b   :  { %3273 = vmatprep.subr.bf16.mxu0 %v3506_v0 }
 0x29d   :  { %3270 = vmatmul.mubr.msk.bf16.vlgmr.msra.gmra.mrb[0].mxu0 %vm227_vm1, %v993_v27  ;;  %v3519_v27 = vld [vmem:[%s4294_s5 + $0x1a8] sm:$0xff]  }
 0x29e   :  { %3274 = vmatpush3.bf16.msra.mxu0 %v3506_v0  ;;  %3281 = vmatprep.mubr.msk.bf16.mxu0 %vm227_vm1, %v994_v19  ;;  %v3529_v19 = vld [vmem:[%s4294_s5 + $0x1f8] sm:$0xff]  }
 0x29f   :  { %3275 = vmatprep.subr.bf16.mxu0 %v3507_v5 }
 0x2a2   :  { %3276 = vmatpush3.bf16.msra.mxu0 %v3507_v5 }
 0x2a3   :  { %3277 = vmatprep.subr.bf16.mxu0 %v3508_v6 }
 0x2a6   :  { %3278 = vmatpush3.bf16.msra.mxu0 %v3508_v6 }
 0x2a7   :  { %3279 = vmatprep.subr.bf16.mxu0 %v3509_v7 }
 0x2aa   :  { %3280 = vmatpush3.bf16.msra.mxu0 %v3509_v7  ;;  %v2499_v7 = vld [vmem:[%s4296_s7] sm:$0x1] }
 0x2ab   :  { %3285 = vmatprep.subr.bf16.mxu0 %v3510_v9 }
 0x2ad   :  { %3282 = vmatmul.mubr.msk.bf16.vlgmr.msra.gmra.mrb[0].mxu0 %vm227_vm1, %v995_v30  ;;  %v3527_v30 = vld [vmem:[%s4294_s5 + $0x1e8] sm:$0xff]  }
 0x2ae   :  { %3286 = vmatpush3.bf16.msra.mxu0 %v3510_v9  ;;  %3293 = vmatprep.mubr.msk.bf16.mxu0 %vm227_vm1, %v996_v62 }
 0x2af   :  { %3287 = vmatprep.subr.bf16.mxu0 %v3511_v11 }
 0x2b2   :  { %3288 = vmatpush3.bf16.msra.mxu0 %v3511_v11 }
 0x2b3   :  { %3289 = vmatprep.subr.bf16.mxu0 %v3512_v13 }
 0x2b6   :  { %3290 = vmatpush3.bf16.msra.mxu0 %v3512_v13 }
 0x2b7   :  { %3291 = vmatprep.subr.bf16.mxu0 %v3513_v17 }
 0x2ba   :  { %3292 = vmatpush3.bf16.msra.mxu0 %v3513_v17 }
 0x2bb   :  { %3297 = vmatprep.subr.bf16.mxu0 %v3514_v20 }
 0x2bd   :  { %3294 = vmatmul.mubr.msk.bf16.vlgmr.msra.gmra.mrb[0].mxu0 %vm227_vm1, %v997_v33 }
 0x2be   :  { %3298 = vmatpush3.bf16.msra.mxu0 %v3514_v20  ;;  %3305 = vmatprep.mubr.msk.bf16.mxu0 %vm227_vm1, %v998_v40 }
 0x2bf   :  { %3299 = vmatprep.subr.bf16.mxu0 %v3515_v21 }
 0x2c2   :  { %3300 = vmatpush3.bf16.msra.mxu0 %v3515_v21 }
 0x2c3   :  { %3301 = vmatprep.subr.bf16.mxu0 %v3516_v22 }
 0x2c6   :  { %3302 = vmatpush3.bf16.msra.mxu0 %v3516_v22 }
 0x2c7   :  { %3303 = vmatprep.subr.bf16.mxu0 %v3517_v24 }
 0x2ca   :  { %3304 = vmatpush3.bf16.msra.mxu0 %v3517_v24 }
 0x2cb   :  { %3309 = vmatprep.subr.bf16.mxu0 %v3518_v25 }
 0x2cd   :  { %3306 = vmatmul.mubr.msk.bf16.vlgmr.msra.gmra.mrb[0].mxu0 %vm227_vm1, %v999_v37 }
 0x2ce   :  { %3310 = vmatpush3.bf16.msra.mxu0 %v3518_v25  ;;  %3317 = vmatprep.mubr.msk.bf16.mxu0 %vm227_vm1, %v1000_v48 }
 0x2cf   :  { %3311 = vmatprep.subr.bf16.mxu0 %v3519_v27 }
 0x2d2   :  { %3312 = vmatpush3.bf16.msra.mxu0 %v3519_v27 }
 0x2d3   :  { %3313 = vmatprep.subr.bf16.mxu0 %v3520_v29 }
 0x2d6   :  { %3314 = vmatpush3.bf16.msra.mxu0 %v3520_v29 }
 0x2d7   :  { %3315 = vmatprep.subr.bf16.mxu0 %v3521_v31 }
 0x2da   :  { %3316 = vmatpush3.bf16.msra.mxu0 %v3521_v31 }
 0x2db   :  { %3321 = vmatprep.subr.bf16.mxu0 %v3522_v12 }
 0x2dd   :  { %3318 = vmatmul.mubr.msk.bf16.vlgmr.msra.gmra.mrb[0].mxu0 %vm227_vm1, %v1001_v46 }
 0x2de   :  { %3322 = vmatpush3.bf16.msra.mxu0 %v3522_v12  ;;  %3329 = vmatprep.mubr.msk.bf16.mxu0 %vm227_vm1, %v1002_v58  ;;  %v2536_v12 = vld [vmem:[%s4297_s8 + $0x10] sm:$0xff] }
 0x2df   :  { %3323 = vmatprep.subr.bf16.mxu0 %v3523_v15 }
 0x2e2   :  { %3324 = vmatpush3.bf16.msra.mxu0 %v3523_v15  ;;  %v2534_v15 = vld [vmem:[%s4297_s8] sm:$0xff] }
 0x2e3   :  { %3325 = vmatprep.subr.bf16.mxu0 %v3524_v10 }
 0x2e6   :  { %3326 = vmatpush3.bf16.msra.mxu0 %v3524_v10 }
 0x2e7   :  { %3327 = vmatprep.subr.bf16.mxu0 %v3525_v16 }
 0x2ea   :  { %3328 = vmatpush3.bf16.msra.mxu0 %v3525_v16 }
 0x2eb   :  { %3333 = vmatprep.subr.bf16.mxu0 %v3526_v14 }
 0x2ed   :  { %3330 = vmatmul.mubr.msk.bf16.vlgmr.msra.gmra.mrb[0].mxu0 %vm227_vm1, %v1003_v56 }
 0x2ee   :  { %3334 = vmatpush3.bf16.msra.mxu0 %v3526_v14  ;;  %3341 = vmatprep.mubr.msk.bf16.mxu0 %vm227_vm1, %v1004_v4  ;;  %v2495_v4 = vld [vmem:[%s4295_s6] sm:$0x1] }
 0x2ef   :  { %3335 = vmatprep.subr.bf16.mxu0 %v3527_v30 }
 0x2f2   :  { %3336 = vmatpush3.bf16.msra.mxu0 %v3527_v30 }
 0x2f3   :  { %3337 = vmatprep.subr.bf16.mxu0 %v3528_v23 }
 0x2f6   :  { %3338 = vmatpush3.bf16.msra.mxu0 %v3528_v23 }
 0x2f7   :  { %3339 = vmatprep.subr.bf16.mxu0 %v3529_v19 }
 0x2fa   :  { %3340 = vmatpush3.bf16.msra.mxu0 %v3529_v19 }
 0x2fd   :  { %3342 = vmatmul.mubr.msk.bf16.vlgmr.msra.gmra.mrb[0].mxu0 %vm227_vm1, %v1005_v2 }
 0x31f   :  { %v3187_v26 = vpop.f32.mrb[80].mxu1 }
 0x320   :  { %v1254_v38 = vpop.f32.mrb[81].mxu1 }
 0x321   :  { %v3188_v32 = vpop.f32.mrb[82].mxu1 }
 0x322   :  { %v1257_v28 = vpop.f32.mrb[83].mxu1 }
 0x3d0   :  { %v3343_v35 = vpop.f32.mrb[0].mxu0 }
 0x3d1   :  { %v3362_v33 = vadd.f32 %v3343_v35, %v3187_v26  ;;  %v2450_v54 = vpop.f32.mrb[1].mxu0  ;;  %v2535_v35 = vld [vmem:[%s4297_s8 + $0x8] sm:$0xff] }
 0x3d2   :  { %v3363_v62 = vadd.f32 %v2450_v54, %v1254_v38  ;;  %v3344_v34 = vpop.f32.mrb[2].mxu0 }
 0x3d3   :  { %v3364_v52 = vadd.f32 %v3344_v34, %v3188_v32  ;;  %v2453_v59 = vpop.f32.mrb[3].mxu0  ;;  %v2481_v40 = vmul.f32 %v3362_v33, %v3362_v33  ;;  %v2537_v32 = vld [vmem:[%s4297_s8 + $0x18] sm:$0xff]  ;;  %v3536_v34 = vmov 0.0  }
 0x3d4   :  { %v3365_v18 = vadd.f32 %v2453_v59, %v1257_v28  ;;  %v2479_v36 = vmul.f32 %v3363_v62, %v3363_v62  ;;  %3353 = vmatprep.mubr.msk.f32.mxu1 %vm3535_vm6, %v3536_v34 }
 0x3d5   :  { %v2482_v43 = vmul.f32 %v3364_v52, %v3364_v52 }
 0x3d6   :  { %v2469_v37 = vadd.f32 %v3365_v18, %v3363_v62  ;;  %v2480_v39 = vmul.f32 %v3365_v18, %v3365_v18 }
 0x3d8   :  { %v2470_v41 = vadd.f32 %v3362_v33, %v2469_v37  ;;  %v2483_v42 = vadd.f32 %v2480_v39, %v2479_v36 }
 0x3da   :  { %v2471_v44 = vadd.f32 %v3364_v52, %v2470_v41  ;;  %v2484_v45 = vadd.f32 %v2483_v42, %v2481_v40  ;;  %v2550_v41 = vld [vmem:[%s4299_s9] sm:$0x3] }
 0x3dc   :  { %v2472_v46 = vrot.slane %v2471_v44, 4  ;;  %v2485_v47 = vadd.f32 %v2484_v45, %v2482_v43 }
 0x3de   :  { %v2473_v48 = vadd.f32 %v2472_v46, %v2471_v44  ;;  %v2486_v49 = vrot.slane %v2485_v47, 4 }
 0x3e0   :  { %v2474_v50 = vrot.slane %v2473_v48, 2  ;;  %v2487_v51 = vadd.f32 %v2486_v49, %v2485_v47 }
 0x3e2   :  { %v2475_v53 = vadd.f32 %v2474_v50, %v2473_v48  ;;  %v2488_v55 = vrot.slane %v2487_v51, 2 }
 0x3e4   :  { %v2476_v56 = vrot.slane %v2475_v53, 1  ;;  %v2489_v57 = vadd.f32 %v2488_v55, %v2487_v51 }
 0x3e6   :  { %v2477_v58 = vadd.f32 %v2476_v56, %v2475_v53  ;;  %v2490_v60 = vrot.slane %v2489_v57, 1 }
 0x3e8   :  { %v2478_v61 = vmul.f32 0.03125, %v2477_v58  ;;  %v2491_v63 = vadd.f32 %v2490_v60, %v2489_v57 }
 0x3ea   :  { %v2492_v0 = vmul.f32 0.03125, %v2491_v63  ;;  %v2493_v1 = vmul.f32 %v2478_v61, %v2478_v61 }
 0x3ec   :  { %v2494_v2 = vsub.f32 %v2492_v0, %v2493_v1 }
 0x3ee   :  { %v2496_v3 = vadd.f32 1e-05, %v2494_v2 }
 0x3f0   :  { %3532 = vrsqrt.f32 %v2496_v3 }
 0x3fa   :  { %v3533_v5 = vpop.eup %3532 }
 0x3fb   :  { %v2498_v6 = vmul.f32 %v3533_v5, %v2495_v4 }
 0x3fd   :  { %v2500_v9 = vmul.f32 %v2498_v6, %v2478_v61  ;;  %v2506_v11 = vrot.slane %v2498_v6, %v3745_v8 }
 0x3ff   :  { %v2509_v13 = vmul.f32 %v3365_v18, %v2506_v11  ;;  %v2501_v17 = vsub.f32 %v2499_v7, %v2500_v9  ;;  %v2510_v20 = vmul.f32 %v3362_v33, %v2506_v11  ;;  %v2508_v21 = vmul.f32 %v3363_v62, %v2506_v11 }
 0x400   :  { %v2511_v22 = vmul.f32 %v3364_v52, %v2506_v11  ;;  %v3534_v62 = vmov 0.0|0.0   ;;  %v16_v52 = vstv %s4298_s10 }
 0x401   :  { %v2516_v24 = vrot.slane %v2501_v17, %v3745_v8  ;;  %3356 = vmatprep.subr.bf16.mxu1 %v3534_v62  ;;  %17 = vst [vmem:[#allocation2] sm:$0x1] %v16_v52 }
 0x403   :  { %v2520_v25 = vadd.f32 %v2516_v24, %v2510_v20  ;;  %v2518_v27 = vadd.f32 %v2516_v24, %v2508_v21  ;;  %v2521_v29 = vadd.f32 %v2516_v24, %v2511_v22  ;;  %v2519_v31 = vadd.f32 %v2516_v24, %v2509_v13 }
 0x405   :  { %vm2524_vm1 = vcmp.gt.f32.partialorder %v2520_v25, 0.0  ;;  %v2528_v10 = vmul.f32 0.2, %v2520_v25  ;;  %vm2522_vm3 = vcmp.gt.f32.partialorder %v2518_v27, 0.0  ;;  %v2526_v16 = vmul.f32 0.2, %v2518_v27 }
 0x406   :  { %vm2525_vm4 = vcmp.gt.f32.partialorder %v2521_v29, 0.0  ;;  %v2529_v14 = vmul.f32 0.2, %v2521_v29  ;;  %vm2523_vm5 = vcmp.gt.f32.partialorder %v2519_v31, 0.0  ;;  %v2527_v8 = vmul.f32 0.2, %v2519_v31 }
 0x407   :  { %v2532_v30 = vsel %vm2524_vm1, %v2520_v25, %v2528_v10  ;;  %v2530_v23 = vsel %vm2522_vm3, %v2518_v27, %v2526_v16 }
 0x408   :  { %v2540_v19 = vmul.f32 %v2536_v12, %v2532_v30  ;;  %v2538_v26 = vmul.f32 %v2534_v15, %v2530_v23  ;;  %v2533_v38 = vsel %vm2525_vm4, %v2521_v29, %v2529_v14  ;;  %v2531_v28 = vsel %vm2523_vm5, %v2519_v31, %v2527_v8  ;;  %v2903_v42 = vld [vmem:[#allocation2] ss:$0 sm:$0xff] }
 0x409   :  { %v2541_v33 = vmul.f32 %v2537_v32, %v2533_v38  ;;  %v2539_v54 = vmul.f32 %v2535_v35, %v2531_v28 }
 0x40a   :  { %2546 = vadd.xlane.f32.xlu1 %v2540_v19  ;;  %2542 = vadd.xlane.f32.xlu0 %v2538_v26 }
 0x40e   :  { %2548 = vadd.xlane.f32.xlu1 %v2541_v33  ;;  %2544 = vadd.xlane.f32.xlu0 %v2539_v54 }
 0x497   :  { %v2547_v59 = vpop.xlane.xlu1 %2546  ;;  %v2543_v18 = vpop.xlane.xlu0 %2542 }
 0x49b   :  { %v2545_v36 = vpop.xlane.xlu0 %2544  ;;  %v2549_v39 = vpop.xlane.xlu1 %2548 }
 0x49c   :  { %v3357_v37 = vpack.c.bf16 %v2545_v36, %v2543_v18  ;;  %v3360_v40 = vpack.c.bf16 %v2549_v39, %v2547_v59 }
 0x49e   :  { %3358 = vmatpush3.bf16.msra.mxu1 %v3357_v37 }
 0x49f   :  { %3359 = vmatprep.subr.bf16.mxu1 %v3534_v62 }
 0x4a2   :  { %3361 = vmatpush3.bf16.msra.mxu1 %v3360_v40 }
 0x4a5   :  { %3354 = vmatmul.mubr.msk.f32.vlgmr.msra.gmra.mrb[84].mxu1 %vm2558_vm7, %v2550_v41 }
 0x578   :  { %v2628_v43 = vpop.f32.mrb[84].mxu1 }
 0x579   :  { %v2629_v44 = vadd.f32 %v2903_v42, %v2628_v43  ;;  %v3355_v45 = vpop.f32.mrb[85].mxu1 }
 0x57b   :  { %2633 = vst.msk [vmem:[%s4300_s11] sm:$0x3] %vm2632_vm8, %v2629_v44 }

</bundles_post_ra>
